<compile_context>
chip_gen: v7x
topology: tpu7x:2x2x1
jax: 0.10.0
libtpu: 0.0.40
codegen_flags: <defaults>
</compile_context>

<pallas_src>
import functools

import jax
import jax.numpy as jnp
from jax.experimental import pallas as pl
from jax.experimental.pallas import tpu as pltpu

CLIP_VAL = 8
FRACTION_BITS = 12
_SCALE_UP = float(1 << FRACTION_BITS)     # 2**12 (exact power of two)
_SCALE_DOWN = 1.0 / _SCALE_UP             # exact power of two


def make_fxp(x):
    """Fixed-point (Q3.12) quantization identical to the PyTorch make_fxp."""
    hi = CLIP_VAL - _SCALE_DOWN
    x = jnp.clip(x, -hi, hi)                        # single clamp == the two wheres
    x = (x * _SCALE_UP).astype(jnp.int32)           # truncation toward zero
    return x.astype(jnp.float32) * _SCALE_DOWN      # exact power-of-two rescale


def make_fxp_scaled(x, pre_scale):
    """Bit-identical to make_fxp(x * pre_scale), with the two multiplies fused.

    (x*s)*2^12 == x*(s*2^12) exactly in f32 (2^12 scaling is exact and the
    rounding grid scales with it), and clipping commutes with the exact
    power-of-two scaling, so the clamp is applied in the scaled domain at
    +/-(CLIP_VAL*2^12 - 1) = +/-32767.
    """
    hi = CLIP_VAL * _SCALE_UP - 1.0                 # 32767.0 == (8 - 2^-12) * 2^12
    t = x * (pre_scale * _SCALE_UP)
    t = jnp.clip(t, -hi, hi)
    return t.astype(jnp.int32).astype(jnp.float32) * _SCALE_DOWN


def _head_attention(x2, wqkv_h, wproj_h, *, batch, seq, dim_head, scale):
    """One head's (pre-bias) contribution to the output projection.

    x2:      (batch*seq, D)
    wqkv_h:  (D, 3*dim_head)  fused [q | k | v] projection weight for this head
    wproj_h: (dim_head, D)    this head's rows of the output projection weight
    returns  (batch*seq, D)   f32 partial product (summed over heads, then +bias)
    """
    # Fused per-head QKV projection: one matmul of output width 3*dim_head.
    qkv = make_fxp(jnp.dot(x2, wqkv_h, preferred_element_type=jnp.float32))
    q = qkv[:, 0 * dim_head:1 * dim_head].reshape(batch, seq, dim_head)
    k = qkv[:, 1 * dim_head:2 * dim_head].reshape(batch, seq, dim_head)
    v = qkv[:, 2 * dim_head:3 * dim_head].reshape(batch, seq, dim_head)

    # Scores: batched contraction over dim_head, no explicit k^T.  The *scale
    # is folded into the quantizer's power-of-two multiply (bit-identical).
    dots = jnp.einsum("bnd,bmd->bnm", q, k, preferred_element_type=jnp.float32)
    dots = make_fxp_scaled(dots, scale)

    # Softmax over keys.  Exact division kept: an approximate reciprocal could
    # move values across the Q-.12 truncation boundary.
    m = jnp.max(dots, axis=-1, keepdims=True)
    e = jnp.exp(dots - m)
    attn = e / jnp.sum(e, axis=-1, keepdims=True)
    attn = make_fxp(attn)            # dropout(p=0) identity; 2nd make_fxp idempotent

    out_h = jnp.einsum("bnm,bmd->bnd", attn, v, preferred_element_type=jnp.float32)
    out_h = make_fxp(out_h).reshape(batch * seq, dim_head)

    # Fused head-merge + projection: this head's lane-dense (rows, D) partial
    # product; the (rows, heads*dim_head) concatenated tensor is never built.
    return jnp.dot(out_h, wproj_h, preferred_element_type=jnp.float32)


def attention_kernel(x_ref, wqkv_ref, wproj_ref, bproj_ref, o_ref, acc_ref,
                     *, dim_head, scale):
    h = pl.program_id(1)                             # head grid axis (arbitrary)
    tb, seq, model_dim = x_ref.shape

    @pl.when(h == 0)
    def _init():
        acc_ref[...] = jnp.zeros_like(acc_ref)

    # Leading-dim merge only (tb == 1 or seq % 8 == 0 enforced by the wrapper),
    # so no sublane-splitting relayout is generated.
    x2 = x_ref[...].reshape(tb * seq, model_dim)
    acc_ref[...] += _head_attention(
        x2, wqkv_ref[h], wproj_ref[h],               # dynamic leading-dim index
        batch=tb, seq=seq, dim_head=dim_head, scale=scale)

    @pl.when(h == pl.num_programs(1) - 1)
    def _finalize():
        # drop_projection(p=0) is identity; its trailing make_fxp is idempotent.
        proj = make_fxp(acc_ref[...] + bproj_ref[...])
        o_ref[...] = proj.reshape(tb, seq, model_dim).astype(o_ref.dtype)


def _device_params():
    """Generation-aware (vmem_limit_bytes, target_rows, min_batch_blocks).

    v5e/v6e: 128 MiB physical VMEM, 1 TensorCore -> big tiles, 64 MiB limit.
    v7x:     64 MiB physical VMEM, 2 TensorCores -> smaller tiles and keep the
             "parallel" batch axis at >= 2 blocks so both cores are used.
    """
    kind = ""
    try:
        kind = jax.devices()[0].device_kind.lower()
    except Exception:
        pass
    vmem_cap = None
    try:
        vmem_cap = int(pltpu.get_tpu_info().vmem_capacity_bytes)
    except Exception:
        vmem_cap = None

    two_cores = "7" in kind                          # v7x family
    small_vmem = two_cores or (vmem_cap is not None and vmem_cap <= 64 * 1024 * 1024)
    if small_vmem:
        limit, target_rows, min_blocks = 48 * 1024 * 1024, 256, (2 if two_cores else 1)
    else:
        limit, target_rows, min_blocks = 64 * 1024 * 1024, 512, 1
    if vmem_cap is not None:
        limit = min(limit, (vmem_cap * 3) // 4)      # stay under physical VMEM
    return limit, target_rows, min_blocks


def _pick_block_b(batch, seq, target_rows, min_batch_blocks):
    """Batch tile: biggest divisor of `batch` with ~target_rows fused rows, but
    (a) tb = 1 when seq % 8 != 0 (keeps in-kernel reshapes layout-free) and
    (b) at least `min_batch_blocks` steps on the parallel batch grid axis."""
    if seq % 8 != 0:
        return 1
    tb = max(1, min(batch, target_rows // max(seq, 1)))
    tb = min(tb, max(1, batch // max(min_batch_blocks, 1)))
    while batch % tb:
        tb -= 1
    return max(tb, 1)


def attention_pallas(x, wqkv, wproj, bproj, *, heads, dim_head, block_b=None):
    """x: (B, N, D); wqkv: (D, 3*inner); wproj: (inner, D); bproj: (D,)."""
    B, N, D = x.shape
    inner = heads * dim_head
    assert wqkv.shape == (D, 3 * inner) and wproj.shape == (inner, D)
    scale = float(dim_head) ** -0.5

    # ---- host-side weight plumbing (one-off layout work, outside the kernel).
    wq, wk, wv = jnp.split(wqkv, 3, axis=-1)                     # (D, inner) each
    per_head = lambda w: w.reshape(D, heads, dim_head).transpose(1, 0, 2)
    # Fused per-head [q | k | v] projection weight: (H, D, 3*dim_head).
    wqkv_h = jnp.concatenate(
        [per_head(wq), per_head(wk), per_head(wv)], axis=-1)
    wproj_h = wproj.reshape(heads, dim_head, D)                  # (H, dh, D)
    bproj2d = bproj.reshape(1, D)

    vmem_limit, target_rows, min_blocks = _device_params()
    tb = (_pick_block_b(B, N, target_rows, min_blocks)
          if block_b is None else block_b)
    assert B % tb == 0
    grid = (B // tb, heads)

    kernel = functools.partial(attention_kernel, dim_head=dim_head, scale=scale)

    try:
        cost = pl.CostEstimate(
            flops=2 * B * N * (3 * D * inner + 2 * N * inner + inner * D),
            transcendentals=B * heads * N * N,
            bytes_accessed=4 * (2 * B * N * D + wqkv.size + wproj.size + bproj.size),
        )
    except Exception:
        cost = None

    def build(single_buffer_weights):
        def wspec(shape):
            # Weights are grid-invariant (constant index map): they are DMA'd
            # once and stay resident; request a single buffer so they are not
            # pointlessly double-buffered.
            kw = {}
            if single_buffer_weights:
                kw["pipeline_mode"] = pl.Buffered(1)
            zeros = (0,) * len(shape)
            return pl.BlockSpec(shape, lambda b, h, _z=zeros: _z, **kw)

        return pl.pallas_call(
            kernel,
            out_shape=jax.ShapeDtypeStruct((B, N, D), jnp.float32),
            grid_spec=pltpu.PrefetchScalarGridSpec(
                num_scalar_prefetch=0,
                grid=grid,
                in_specs=[
                    # x block constant across the head axis -> not re-DMA'd.
                    pl.BlockSpec((tb, N, D), lambda b, h: (b, 0, 0)),
                    wspec((heads, D, 3 * dim_head)),
                    wspec((heads, dim_head, D)),
                    wspec((1, D)),
                ],
                # Output block constant across the head (reduction) axis.
                out_specs=pl.BlockSpec((tb, N, D), lambda b, h: (b, 0, 0)),
                scratch_shapes=[pltpu.VMEM((tb * N, D), jnp.float32)],
            ),
            compiler_params=pltpu.CompilerParams(
                dimension_semantics=("parallel", "arbitrary"),
                vmem_limit_bytes=vmem_limit,
            ),
            cost_estimate=cost,
        )

    args = (x, wqkv_h, wproj_h, bproj2d)
    try:
        return build(single_buffer_weights=True)(*args)
    except Exception:
        # Fallback for jax versions without pipeline_mode / Buffered(1) support:
        # identical semantics, default (double) buffering for the weights.
        return build(single_buffer_weights=False)(*args)


def attention_reference_matched(x, wqkv, wproj, bproj, *, heads, dim_head):
    """Pure-JAX reference using the exact same op ordering as the kernel."""
    B, N, D = x.shape
    scale = float(dim_head) ** -0.5
    wq, wk, wv = jnp.split(wqkv, 3, axis=-1)
    per_head = lambda w: w.reshape(D, heads, dim_head).transpose(1, 0, 2)
    wqkv_h = jnp.concatenate([per_head(wq), per_head(wk), per_head(wv)], axis=-1)
    wproj_h = wproj.reshape(heads, dim_head, D)
    x2 = x.reshape(B * N, D)
    acc = jnp.zeros((B * N, D), jnp.float32)
    for h in range(heads):
        acc = acc + _head_attention(x2, wqkv_h[h], wproj_h[h],
                                    batch=B, seq=N, dim_head=dim_head, scale=scale)
    return make_fxp(acc + bproj.reshape(1, D)).reshape(B, N, D)


def attention_reference(x, wqkv, wproj, bproj, *, heads, dim_head):
    """Straightforward pure-JAX mirror of the PyTorch forward (dropout p=0)."""
    B, N, D = x.shape
    inner = heads * dim_head
    scale = float(dim_head) ** -0.5
    qkv = x @ wqkv
    q, k, v = jnp.split(qkv, 3, axis=-1)
    to_heads = lambda t: t.reshape(B, N, heads, dim_head).transpose(0, 2, 1, 3)
    q, k, v = (make_fxp(to_heads(t)) for t in (q, k, v))
    dots = make_fxp(jnp.einsum("bhnd,bhmd->bhnm", q, k) * scale)
    m = jnp.max(dots, axis=-1, keepdims=True)
    e = jnp.exp(dots - m)
    attn = make_fxp(e / jnp.sum(e, axis=-1, keepdims=True))
    attn = make_fxp(attn)                        # dropout p=0 -> identity
    out = make_fxp(jnp.einsum("bhnm,bhmd->bhnd", attn, v))
    out = out.transpose(0, 2, 1, 3).reshape(B, N, inner)
    proj = make_fxp(out @ wproj + bproj)
    return make_fxp(proj)                        # drop_projection p=0 -> identity


if __name__ == "__main__":
    # Small shapes consistent with the module: dim=32, heads=4, dim_head=8.
    B, N, D = 2, 8, 32
    heads, dim_head = 4, 8
    inner = heads * dim_head

    key = jax.random.PRNGKey(0)
    kx, kq, kp, kb = jax.random.split(key, 4)
    x = jax.random.normal(kx, (B, N, D), dtype=jnp.float32)
    wqkv = jax.random.normal(kq, (D, 3 * inner), dtype=jnp.float32) * (D ** -0.5)
    wproj = jax.random.normal(kp, (inner, D), dtype=jnp.float32) * (inner ** -0.5)
    bproj = jax.random.normal(kb, (D,), dtype=jnp.float32) * 0.02

    out = attention_pallas(x, wqkv, wproj, bproj, heads=heads, dim_head=dim_head)
    out = jax.block_until_ready(out)
    assert out.shape == (B, N, D)

    # Strict check against a reference with identical op ordering.
    ref_m = attention_reference_matched(x, wqkv, wproj, bproj,
                                        heads=heads, dim_head=dim_head)
    assert jnp.allclose(out, ref_m, atol=1e-5), "mismatch vs matched reference"

    # Check against the PyTorch-order reference: the fused head-merge/projection
    # only changes f32 summation order, so any difference is at most one
    # Q-.12 LSB at a truncation boundary.
    ref_p = attention_reference(x, wqkv, wproj, bproj,
                                heads=heads, dim_head=dim_head)
    max_diff = float(jnp.max(jnp.abs(out - ref_p)))
    assert max_diff <= (2.0 ** -FRACTION_BITS) + 1e-5, \
        "mismatch vs PyTorch-order reference beyond one fixed-point LSB"

    print("KERNEL_OK")
</pallas_src>

<mosaic_0001>
module attributes {stable_mosaic.version = 11 : i64} {
  func.func @attention_kernel(%arg0: i32, %arg1: i32, %arg2: memref<2x8x32xf32, #tpu.memory_space<vmem>>, %arg3: memref<4x32x24xf32, #tpu.memory_space<vmem>>, %arg4: memref<4x8x32xf32, #tpu.memory_space<vmem>>, %arg5: memref<1x32xf32, #tpu.memory_space<vmem>>, %arg6: memref<2x8x32xf32, #tpu.memory_space<vmem>>, %arg7: memref<16x32xf32, #tpu.memory_space<vmem>>) attributes {dimension_semantics = [#tpu.dimension_semantics<parallel>, #tpu.dimension_semantics<arbitrary>], iteration_bounds = array<i64: 1, 4>, scalar_prefetch = 0 : i64, scratch_operands = 1 : i64, tpu.core_type = #tpu.core_type<tc>, window_params = [{transform_indices = @transform_0, window_bounds = array<i64: 2, 8, 32>}, {pipeline_mode = #tpu.pipeline_mode<synchronous>, transform_indices = @transform_1, window_bounds = array<i64: 4, 32, 24>}, {pipeline_mode = #tpu.pipeline_mode<synchronous>, transform_indices = @transform_2, window_bounds = array<i64: 4, 8, 32>}, {pipeline_mode = #tpu.pipeline_mode<synchronous>, transform_indices = @transform_3, window_bounds = array<i64: 1, 32>}, {transform_indices = @transform_4, window_bounds = array<i64: 2, 8, 32>}]} {
    %c0_i32 = arith.constant 0 : i32
    %0 = arith.cmpi eq, %arg1, %c0_i32 : i32
    %1 = arith.extui %0 : i1 to i32
    %c0_i32_0 = arith.constant 0 : i32
    %2 = arith.cmpi ne, %1, %c0_i32_0 : i32
    scf.if %2 {
      %cst_33 = arith.constant 0.000000e+00 : f32
      %77 = vector.broadcast %cst_33 : f32 to vector<16x32xf32>
      %c0_34 = arith.constant 0 : index
      %c0_35 = arith.constant 0 : index
      %78 = vector.load %arg7[%c0_34, %c0_35] : memref<16x32xf32, #tpu.memory_space<vmem>>, vector<16x32xf32>
      tpu.vector_store %arg7[%c0_34, %c0_35], %77 {strides = array<i32>} : memref<16x32xf32, #tpu.memory_space<vmem>>, vector<16x32xf32>,
    } else {
    }
    %c0 = arith.constant 0 : index
    %c0_1 = arith.constant 0 : index
    %c0_2 = arith.constant 0 : index
    %3 = vector.load %arg2[%c0, %c0_1, %c0_2] : memref<2x8x32xf32, #tpu.memory_space<vmem>>, vector<2x8x32xf32>
    %4 = vector.shape_cast %3 : vector<2x8x32xf32> to vector<16x32xf32>
    %c0_3 = arith.constant 0 : index
    %c0_4 = arith.constant 0 : index
    %5 = vector.load %arg7[%c0_3, %c0_4] : memref<16x32xf32, #tpu.memory_space<vmem>>, vector<16x32xf32>
    %6 = arith.index_cast %arg1 : i32 to index
    %c0_5 = arith.constant 0 : index
    %c0_6 = arith.constant 0 : index
    %7 = vector.load %arg3[%6, %c0_5, %c0_6] : memref<4x32x24xf32, #tpu.memory_space<vmem>>, vector<1x32x24xf32>
    %8 = vector.shape_cast %7 : vector<1x32x24xf32> to vector<32x24xf32>
    %9 = arith.index_cast %arg1 : i32 to index
    %c0_7 = arith.constant 0 : index
    %c0_8 = arith.constant 0 : index
    %10 = vector.load %arg4[%9, %c0_7, %c0_8] : memref<4x8x32xf32, #tpu.memory_space<vmem>>, vector<1x8x32xf32>
    %11 = vector.shape_cast %10 : vector<1x8x32xf32> to vector<8x32xf32>
    %cst = arith.constant dense<0.000000e+00> : vector<16x24xf32>
    %12 = tpu.matmul %4, %8, %cst {dimension_numbers = #tpu.dot_dimension_numbers<[1], [0], [0], [1], [0, 0, 1, 1], [], []>} : vector<16x32xf32>, vector<32x24xf32>, vector<16x24xf32> -> vector<16x24xf32>
    %cst_9 = arith.constant -7.99975586 : f32
    %cst_10 = arith.constant 7.99975586 : f32
    %13 = vector.broadcast %cst_9 : f32 to vector<16x24xf32>
    %14 = arith.maximumf %13, %12 : vector<16x24xf32>
    %15 = vector.broadcast %cst_10 : f32 to vector<16x24xf32>
    %16 = arith.minimumf %15, %14 : vector<16x24xf32>
    %cst_11 = arith.constant 4.096000e+03 : f32
    %17 = vector.broadcast %cst_11 : f32 to vector<16x24xf32>
    %18 = arith.mulf %16, %17 : vector<16x24xf32>
    %19 = arith.fptosi %18 : vector<16x24xf32> to vector<16x24xi32>
    %20 = arith.sitofp %19 : vector<16x24xi32> to vector<16x24xf32>
    %cst_12 = arith.constant 2.44140625E-4 : f32
    %21 = vector.broadcast %cst_12 : f32 to vector<16x24xf32>
    %22 = arith.mulf %20, %21 : vector<16x24xf32>
    %23 = vector.extract_strided_slice %22 {offsets = [0, 0], sizes = [16, 8], strides = [1, 1]} : vector<16x24xf32> to vector<16x8xf32>
    %24 = vector.shape_cast %23 : vector<16x8xf32> to vector<2x8x8xf32>
    %25 = vector.extract_strided_slice %22 {offsets = [0, 8], sizes = [16, 8], strides = [1, 1]} : vector<16x24xf32> to vector<16x8xf32>
    %26 = vector.shape_cast %25 : vector<16x8xf32> to vector<2x8x8xf32>
    %27 = vector.extract_strided_slice %22 {offsets = [0, 16], sizes = [16, 8], strides = [1, 1]} : vector<16x24xf32> to vector<16x8xf32>
    %28 = vector.shape_cast %27 : vector<16x8xf32> to vector<2x8x8xf32>
    "tpu.trace_start"() <{level = 10 : i32, message = "bnd,bmd->bnm"}> : () -> ()
    %cst_13 = arith.constant dense<0.000000e+00> : vector<2x8x8xf32>
    %29 = tpu.matmul %24, %26, %cst_13 {dimension_numbers = #tpu.dot_dimension_numbers<[2], [2], [1], [1], [0, 0, 0, 1, 1, 1], [0], [0]>} : vector<2x8x8xf32>, vector<2x8x8xf32>, vector<2x8x8xf32> -> vector<2x8x8xf32>
    "tpu.trace_stop"() : () -> ()
    %cst_14 = arith.constant 1448.15466 : f32
    %30 = vector.broadcast %cst_14 : f32 to vector<2x8x8xf32>
    %31 = arith.mulf %29, %30 : vector<2x8x8xf32>
    %cst_15 = arith.constant -3.276700e+04 : f32
    %cst_16 = arith.constant 3.276700e+04 : f32
    %32 = vector.broadcast %cst_15 : f32 to vector<2x8x8xf32>
    %33 = arith.maximumf %32, %31 : vector<2x8x8xf32>
    %34 = vector.broadcast %cst_16 : f32 to vector<2x8x8xf32>
    %35 = arith.minimumf %34, %33 : vector<2x8x8xf32>
    %36 = arith.fptosi %35 : vector<2x8x8xf32> to vector<2x8x8xi32>
    %37 = arith.sitofp %36 : vector<2x8x8xi32> to vector<2x8x8xf32>
    %cst_17 = arith.constant 2.44140625E-4 : f32
    %38 = vector.broadcast %cst_17 : f32 to vector<2x8x8xf32>
    %39 = arith.mulf %37, %38 : vector<2x8x8xf32>
    %cst_18 = arith.constant dense<0xFF800000> : vector<2x8xf32>
    %40 = vector.multi_reduction <maximumf>, %39, %cst_18 [2] : vector<2x8x8xf32> to vector<2x8xf32>
    %41 = vector.shape_cast %40 : vector<2x8xf32> to vector<2x8x1xf32>
    %42 = vector.broadcast %41 : vector<2x8x1xf32> to vector<2x8x8xf32>
    %43 = arith.subf %39, %42 : vector<2x8x8xf32>
    %44 = math.exp %43 : vector<2x8x8xf32>
    %cst_19 = arith.constant dense<0.000000e+00> : vector<2x8xf32>
    %45 = vector.multi_reduction <add>, %44, %cst_19 [2] : vector<2x8x8xf32> to vector<2x8xf32>
    %46 = vector.shape_cast %45 : vector<2x8xf32> to vector<2x8x1xf32>
    %47 = vector.broadcast %46 : vector<2x8x1xf32> to vector<2x8x8xf32>
    %48 = arith.divf %44, %47 : vector<2x8x8xf32>
    %cst_20 = arith.constant -7.99975586 : f32
    %cst_21 = arith.constant 7.99975586 : f32
    %49 = vector.broadcast %cst_20 : f32 to vector<2x8x8xf32>
    %50 = arith.maximumf %49, %48 : vector<2x8x8xf32>
    %51 = vector.broadcast %cst_21 : f32 to vector<2x8x8xf32>
    %52 = arith.minimumf %51, %50 : vector<2x8x8xf32>
    %cst_22 = arith.constant 4.096000e+03 : f32
    %53 = vector.broadcast %cst_22 : f32 to vector<2x8x8xf32>
    %54 = arith.mulf %52, %53 : vector<2x8x8xf32>
    %55 = arith.fptosi %54 : vector<2x8x8xf32> to vector<2x8x8xi32>
    %56 = arith.sitofp %55 : vector<2x8x8xi32> to vector<2x8x8xf32>
    %cst_23 = arith.constant 2.44140625E-4 : f32
    %57 = vector.broadcast %cst_23 : f32 to vector<2x8x8xf32>
    %58 = arith.mulf %56, %57 : vector<2x8x8xf32>
    "tpu.trace_start"() <{level = 10 : i32, message = "bnm,bmd->bnd"}> : () -> ()
    %cst_24 = arith.constant dense<0.000000e+00> : vector<2x8x8xf32>
    %59 = tpu.matmul %58, %28, %cst_24 {dimension_numbers = #tpu.dot_dimension_numbers<[2], [1], [1], [2], [0, 0, 0, 1, 1, 2], [0], [0]>} : vector<2x8x8xf32>, vector<2x8x8xf32>, vector<2x8x8xf32> -> vector<2x8x8xf32>
    %cst_25 = arith.constant -7.99975586 : f32
    %cst_26 = arith.constant 7.99975586 : f32
    "tpu.trace_stop"() : () -> ()
    %60 = vector.broadcast %cst_25 : f32 to vector<2x8x8xf32>
    %61 = arith.maximumf %60, %59 : vector<2x8x8xf32>
    %62 = vector.broadcast %cst_26 : f32 to vector<2x8x8xf32>
    %63 = arith.minimumf %62, %61 : vector<2x8x8xf32>
    %cst_27 = arith.constant 4.096000e+03 : f32
    %64 = vector.broadcast %cst_27 : f32 to vector<2x8x8xf32>
    %65 = arith.mulf %63, %64 : vector<2x8x8xf32>
    %66 = arith.fptosi %65 : vector<2x8x8xf32> to vector<2x8x8xi32>
    %67 = arith.sitofp %66 : vector<2x8x8xi32> to vector<2x8x8xf32>
    %cst_28 = arith.constant 2.44140625E-4 : f32
    %68 = vector.broadcast %cst_28 : f32 to vector<2x8x8xf32>
    %69 = arith.mulf %67, %68 : vector<2x8x8xf32>
    %70 = vector.shape_cast %69 : vector<2x8x8xf32> to vector<16x8xf32>
    %cst_29 = arith.constant dense<0.000000e+00> : vector<16x32xf32>
    %71 = tpu.matmul %70, %11, %cst_29 {dimension_numbers = #tpu.dot_dimension_numbers<[1], [0], [0], [1], [0, 0, 1, 1], [], []>} : vector<16x8xf32>, vector<8x32xf32>, vector<16x32xf32> -> vector<16x32xf32>
    %72 = arith.addf %5, %71 : vector<16x32xf32>
    %c0_30 = arith.constant 0 : index
    %c0_31 = arith.constant 0 : index
    %73 = vector.load %arg7[%c0_30, %c0_31] : memref<16x32xf32, #tpu.memory_space<vmem>>, vector<16x32xf32>
    tpu.vector_store %arg7[%c0_30, %c0_31], %72 {strides = array<i32>} : memref<16x32xf32, #tpu.memory_space<vmem>>, vector<16x32xf32>,
    %c3_i32 = arith.constant 3 : i32
    %74 = arith.cmpi eq, %arg1, %c3_i32 : i32
    %75 = arith.extui %74 : i1 to i32
    %c0_i32_32 = arith.constant 0 : i32
    %76 = arith.cmpi ne, %75, %c0_i32_32 : i32
    scf.if %76 {
      %c0_33 = arith.constant 0 : index
      %c0_34 = arith.constant 0 : index
      %77 = vector.load %arg7[%c0_33, %c0_34] : memref<16x32xf32, #tpu.memory_space<vmem>>, vector<16x32xf32>
      %c0_35 = arith.constant 0 : index
      %c0_36 = arith.constant 0 : index
      %78 = vector.load %arg5[%c0_35, %c0_36] : memref<1x32xf32, #tpu.memory_space<vmem>>, vector<1x32xf32>
      %79 = vector.broadcast %78 : vector<1x32xf32> to vector<16x32xf32>
      %80 = arith.addf %77, %79 : vector<16x32xf32>
      %cst_37 = arith.constant -7.99975586 : f32
      %cst_38 = arith.constant 7.99975586 : f32
      %81 = vector.broadcast %cst_37 : f32 to vector<16x32xf32>
      %82 = arith.maximumf %81, %80 : vector<16x32xf32>
      %83 = vector.broadcast %cst_38 : f32 to vector<16x32xf32>
      %84 = arith.minimumf %83, %82 : vector<16x32xf32>
      %cst_39 = arith.constant 4.096000e+03 : f32
      %85 = vector.broadcast %cst_39 : f32 to vector<16x32xf32>
      %86 = arith.mulf %84, %85 : vector<16x32xf32>
      %87 = arith.fptosi %86 : vector<16x32xf32> to vector<16x32xi32>
      %88 = arith.sitofp %87 : vector<16x32xi32> to vector<16x32xf32>
      %cst_40 = arith.constant 2.44140625E-4 : f32
      %89 = vector.broadcast %cst_40 : f32 to vector<16x32xf32>
      %90 = arith.mulf %88, %89 : vector<16x32xf32>
      %91 = vector.shape_cast %90 : vector<16x32xf32> to vector<2x8x32xf32>
      %c0_41 = arith.constant 0 : index
      %c0_42 = arith.constant 0 : index
      %c0_43 = arith.constant 0 : index
      %92 = vector.load %arg6[%c0_41, %c0_42, %c0_43] : memref<2x8x32xf32, #tpu.memory_space<vmem>>, vector<2x8x32xf32>
      tpu.vector_store %arg6[%c0_41, %c0_42, %c0_43], %91 {strides = array<i32>} : memref<2x8x32xf32, #tpu.memory_space<vmem>>, vector<2x8x32xf32>,
    } else {
    }
    return
  }
  func.func @transform_0(%arg0: i32, %arg1: i32) -> (i32, i32, i32) {
    %c0_i32 = arith.constant 0 : i32
    %c0_i32_0 = arith.constant 0 : i32
    %c0_i32_1 = arith.constant 0 : i32
    return %arg0, %c0_i32, %c0_i32_0 : i32, i32, i32
  }
  func.func @transform_1(%arg0: i32, %arg1: i32) -> (i32, i32, i32) {
    %c0_i32 = arith.constant 0 : i32
    %c0_i32_0 = arith.constant 0 : i32
    %c0_i32_1 = arith.constant 0 : i32
    %c0_i32_2 = arith.constant 0 : i32
    return %c0_i32, %c0_i32_0, %c0_i32_1 : i32, i32, i32
  }
  func.func @transform_2(%arg0: i32, %arg1: i32) -> (i32, i32, i32) {
    %c0_i32 = arith.constant 0 : i32
    %c0_i32_0 = arith.constant 0 : i32
    %c0_i32_1 = arith.constant 0 : i32
    %c0_i32_2 = arith.constant 0 : i32
    return %c0_i32, %c0_i32_0, %c0_i32_1 : i32, i32, i32
  }
  func.func @transform_3(%arg0: i32, %arg1: i32) -> (i32, i32) {
    %c0_i32 = arith.constant 0 : i32
    %c0_i32_0 = arith.constant 0 : i32
    %c0_i32_1 = arith.constant 0 : i32
    return %c0_i32, %c0_i32_0 : i32, i32
  }
  func.func @transform_4(%arg0: i32, %arg1: i32) -> (i32, i32, i32) {
    %c0_i32 = arith.constant 0 : i32
    %c0_i32_0 = arith.constant 0 : i32
    %c0_i32_1 = arith.constant 0 : i32
    return %arg0, %c0_i32, %c0_i32_0 : i32, i32, i32
  }
}

module attributes {stable_mosaic.version = 11 : i64} {
  func.func @attention_kernel(%arg0: i32, %arg1: i32, %arg2: memref<2x8x32xf32, #tpu.memory_space<vmem>>, %arg3: memref<4x32x24xf32, #tpu.memory_space<vmem>>, %arg4: memref<4x8x32xf32, #tpu.memory_space<vmem>>, %arg5: memref<1x32xf32, #tpu.memory_space<vmem>>, %arg6: memref<2x8x32xf32, #tpu.memory_space<vmem>>, %arg7: memref<16x32xf32, #tpu.memory_space<vmem>>) attributes {dimension_semantics = [#tpu.dimension_semantics<parallel>, #tpu.dimension_semantics<arbitrary>], iteration_bounds = array<i64: 1, 4>, scalar_prefetch = 0 : i64, scratch_operands = 1 : i64, tpu.core_type = #tpu.core_type<tc>, window_params = [{transform_indices = @transform_0, window_bounds = array<i64: 2, 8, 32>}, {pipeline_mode = #tpu.pipeline_mode<synchronous>, transform_indices = @transform_1, window_bounds = array<i64: 4, 32, 24>}, {pipeline_mode = #tpu.pipeline_mode<synchronous>, transform_indices = @transform_2, window_bounds = array<i64: 4, 8, 32>}, {pipeline_mode = #tpu.pipeline_mode<synchronous>, transform_indices = @transform_3, window_bounds = array<i64: 1, 32>}, {transform_indices = @transform_4, window_bounds = array<i64: 2, 8, 32>}]} {
    %c0_i32 = arith.constant 0 : i32
    %0 = arith.cmpi eq, %arg1, %c0_i32 : i32
    %1 = arith.extui %0 : i1 to i32
    %c0_i32_0 = arith.constant 0 : i32
    %2 = arith.cmpi ne, %1, %c0_i32_0 : i32
    scf.if %2 {
      %cst_33 = arith.constant 0.000000e+00 : f32
      %77 = vector.broadcast %cst_33 : f32 to vector<16x32xf32>
      %c0_34 = arith.constant 0 : index
      %c0_35 = arith.constant 0 : index
      %78 = vector.load %arg7[%c0_34, %c0_35] : memref<16x32xf32, #tpu.memory_space<vmem>>, vector<16x32xf32>
      tpu.vector_store %arg7[%c0_34, %c0_35], %77 {strides = array<i32>} : memref<16x32xf32, #tpu.memory_space<vmem>>, vector<16x32xf32>,
    } else {
    }
    %c0 = arith.constant 0 : index
    %c0_1 = arith.constant 0 : index
    %c0_2 = arith.constant 0 : index
    %3 = vector.load %arg2[%c0, %c0_1, %c0_2] : memref<2x8x32xf32, #tpu.memory_space<vmem>>, vector<2x8x32xf32>
    %4 = vector.shape_cast %3 : vector<2x8x32xf32> to vector<16x32xf32>
    %c0_3 = arith.constant 0 : index
    %c0_4 = arith.constant 0 : index
    %5 = vector.load %arg7[%c0_3, %c0_4] : memref<16x32xf32, #tpu.memory_space<vmem>>, vector<16x32xf32>
    %6 = arith.index_cast %arg1 : i32 to index
    %c0_5 = arith.constant 0 : index
    %c0_6 = arith.constant 0 : index
    %7 = vector.load %arg3[%6, %c0_5, %c0_6] : memref<4x32x24xf32, #tpu.memory_space<vmem>>, vector<1x32x24xf32>
    %8 = vector.shape_cast %7 : vector<1x32x24xf32> to vector<32x24xf32>
    %9 = arith.index_cast %arg1 : i32 to index
    %c0_7 = arith.constant 0 : index
    %c0_8 = arith.constant 0 : index
    %10 = vector.load %arg4[%9, %c0_7, %c0_8] : memref<4x8x32xf32, #tpu.memory_space<vmem>>, vector<1x8x32xf32>
    %11 = vector.shape_cast %10 : vector<1x8x32xf32> to vector<8x32xf32>
    %cst = arith.constant dense<0.000000e+00> : vector<16x24xf32>
    %12 = tpu.matmul %4, %8, %cst {dimension_numbers = #tpu.dot_dimension_numbers<[1], [0], [0], [1], [0, 0, 1, 1], [], []>} : vector<16x32xf32>, vector<32x24xf32>, vector<16x24xf32> -> vector<16x24xf32>
    %cst_9 = arith.constant -7.99975586 : f32
    %cst_10 = arith.constant 7.99975586 : f32
    %13 = vector.broadcast %cst_9 : f32 to vector<16x24xf32>
    %14 = arith.maximumf %13, %12 : vector<16x24xf32>
    %15 = vector.broadcast %cst_10 : f32 to vector<16x24xf32>
    %16 = arith.minimumf %15, %14 : vector<16x24xf32>
    %cst_11 = arith.constant 4.096000e+03 : f32
    %17 = vector.broadcast %cst_11 : f32 to vector<16x24xf32>
    %18 = arith.mulf %16, %17 : vector<16x24xf32>
    %19 = arith.fptosi %18 : vector<16x24xf32> to vector<16x24xi32>
    %20 = arith.sitofp %19 : vector<16x24xi32> to vector<16x24xf32>
    %cst_12 = arith.constant 2.44140625E-4 : f32
    %21 = vector.broadcast %cst_12 : f32 to vector<16x24xf32>
    %22 = arith.mulf %20, %21 : vector<16x24xf32>
    %23 = vector.extract_strided_slice %22 {offsets = [0, 0], sizes = [16, 8], strides = [1, 1]} : vector<16x24xf32> to vector<16x8xf32>
    %24 = vector.shape_cast %23 : vector<16x8xf32> to vector<2x8x8xf32>
    %25 = vector.extract_strided_slice %22 {offsets = [0, 8], sizes = [16, 8], strides = [1, 1]} : vector<16x24xf32> to vector<16x8xf32>
    %26 = vector.shape_cast %25 : vector<16x8xf32> to vector<2x8x8xf32>
    %27 = vector.extract_strided_slice %22 {offsets = [0, 16], sizes = [16, 8], strides = [1, 1]} : vector<16x24xf32> to vector<16x8xf32>
    %28 = vector.shape_cast %27 : vector<16x8xf32> to vector<2x8x8xf32>
    "tpu.trace_start"() <{level = 10 : i32, message = "bnd,bmd->bnm"}> : () -> ()
    %cst_13 = arith.constant dense<0.000000e+00> : vector<2x8x8xf32>
    %29 = tpu.matmul %24, %26, %cst_13 {dimension_numbers = #tpu.dot_dimension_numbers<[2], [2], [1], [1], [0, 0, 0, 1, 1, 1], [0], [0]>} : vector<2x8x8xf32>, vector<2x8x8xf32>, vector<2x8x8xf32> -> vector<2x8x8xf32>
    "tpu.trace_stop"() : () -> ()
    %cst_14 = arith.constant 1448.15466 : f32
    %30 = vector.broadcast %cst_14 : f32 to vector<2x8x8xf32>
    %31 = arith.mulf %29, %30 : vector<2x8x8xf32>
    %cst_15 = arith.constant -3.276700e+04 : f32
    %cst_16 = arith.constant 3.276700e+04 : f32
    %32 = vector.broadcast %cst_15 : f32 to vector<2x8x8xf32>
    %33 = arith.maximumf %32, %31 : vector<2x8x8xf32>
    %34 = vector.broadcast %cst_16 : f32 to vector<2x8x8xf32>
    %35 = arith.minimumf %34, %33 : vector<2x8x8xf32>
    %36 = arith.fptosi %35 : vector<2x8x8xf32> to vector<2x8x8xi32>
    %37 = arith.sitofp %36 : vector<2x8x8xi32> to vector<2x8x8xf32>
    %cst_17 = arith.constant 2.44140625E-4 : f32
    %38 = vector.broadcast %cst_17 : f32 to vector<2x8x8xf32>
    %39 = arith.mulf %37, %38 : vector<2x8x8xf32>
    %cst_18 = arith.constant dense<0xFF800000> : vector<2x8xf32>
    %40 = vector.multi_reduction <maximumf>, %39, %cst_18 [2] : vector<2x8x8xf32> to vector<2x8xf32>
    %41 = vector.shape_cast %40 : vector<2x8xf32> to vector<2x8x1xf32>
    %42 = vector.broadcast %41 : vector<2x8x1xf32> to vector<2x8x8xf32>
    %43 = arith.subf %39, %42 : vector<2x8x8xf32>
    %44 = math.exp %43 : vector<2x8x8xf32>
    %cst_19 = arith.constant dense<0.000000e+00> : vector<2x8xf32>
    %45 = vector.multi_reduction <add>, %44, %cst_19 [2] : vector<2x8x8xf32> to vector<2x8xf32>
    %46 = vector.shape_cast %45 : vector<2x8xf32> to vector<2x8x1xf32>
    %47 = vector.broadcast %46 : vector<2x8x1xf32> to vector<2x8x8xf32>
    %48 = arith.divf %44, %47 : vector<2x8x8xf32>
    %cst_20 = arith.constant -7.99975586 : f32
    %cst_21 = arith.constant 7.99975586 : f32
    %49 = vector.broadcast %cst_20 : f32 to vector<2x8x8xf32>
    %50 = arith.maximumf %49, %48 : vector<2x8x8xf32>
    %51 = vector.broadcast %cst_21 : f32 to vector<2x8x8xf32>
    %52 = arith.minimumf %51, %50 : vector<2x8x8xf32>
    %cst_22 = arith.constant 4.096000e+03 : f32
    %53 = vector.broadcast %cst_22 : f32 to vector<2x8x8xf32>
    %54 = arith.mulf %52, %53 : vector<2x8x8xf32>
    %55 = arith.fptosi %54 : vector<2x8x8xf32> to vector<2x8x8xi32>
    %56 = arith.sitofp %55 : vector<2x8x8xi32> to vector<2x8x8xf32>
    %cst_23 = arith.constant 2.44140625E-4 : f32
    %57 = vector.broadcast %cst_23 : f32 to vector<2x8x8xf32>
    %58 = arith.mulf %56, %57 : vector<2x8x8xf32>
    "tpu.trace_start"() <{level = 10 : i32, message = "bnm,bmd->bnd"}> : () -> ()
    %cst_24 = arith.constant dense<0.000000e+00> : vector<2x8x8xf32>
    %59 = tpu.matmul %58, %28, %cst_24 {dimension_numbers = #tpu.dot_dimension_numbers<[2], [1], [1], [2], [0, 0, 0, 1, 1, 2], [0], [0]>} : vector<2x8x8xf32>, vector<2x8x8xf32>, vector<2x8x8xf32> -> vector<2x8x8xf32>
    %cst_25 = arith.constant -7.99975586 : f32
    %cst_26 = arith.constant 7.99975586 : f32
    "tpu.trace_stop"() : () -> ()
    %60 = vector.broadcast %cst_25 : f32 to vector<2x8x8xf32>
    %61 = arith.maximumf %60, %59 : vector<2x8x8xf32>
    %62 = vector.broadcast %cst_26 : f32 to vector<2x8x8xf32>
    %63 = arith.minimumf %62, %61 : vector<2x8x8xf32>
    %cst_27 = arith.constant 4.096000e+03 : f32
    %64 = vector.broadcast %cst_27 : f32 to vector<2x8x8xf32>
    %65 = arith.mulf %63, %64 : vector<2x8x8xf32>
    %66 = arith.fptosi %65 : vector<2x8x8xf32> to vector<2x8x8xi32>
    %67 = arith.sitofp %66 : vector<2x8x8xi32> to vector<2x8x8xf32>
    %cst_28 = arith.constant 2.44140625E-4 : f32
    %68 = vector.broadcast %cst_28 : f32 to vector<2x8x8xf32>
    %69 = arith.mulf %67, %68 : vector<2x8x8xf32>
    %70 = vector.shape_cast %69 : vector<2x8x8xf32> to vector<16x8xf32>
    %cst_29 = arith.constant dense<0.000000e+00> : vector<16x32xf32>
    %71 = tpu.matmul %70, %11, %cst_29 {dimension_numbers = #tpu.dot_dimension_numbers<[1], [0], [0], [1], [0, 0, 1, 1], [], []>} : vector<16x8xf32>, vector<8x32xf32>, vector<16x32xf32> -> vector<16x32xf32>
    %72 = arith.addf %5, %71 : vector<16x32xf32>
    %c0_30 = arith.constant 0 : index
    %c0_31 = arith.constant 0 : index
    %73 = vector.load %arg7[%c0_30, %c0_31] : memref<16x32xf32, #tpu.memory_space<vmem>>, vector<16x32xf32>
    tpu.vector_store %arg7[%c0_30, %c0_31], %72 {strides = array<i32>} : memref<16x32xf32, #tpu.memory_space<vmem>>, vector<16x32xf32>,
    %c3_i32 = arith.constant 3 : i32
    %74 = arith.cmpi eq, %arg1, %c3_i32 : i32
    %75 = arith.extui %74 : i1 to i32
    %c0_i32_32 = arith.constant 0 : i32
    %76 = arith.cmpi ne, %75, %c0_i32_32 : i32
    scf.if %76 {
      %c0_33 = arith.constant 0 : index
      %c0_34 = arith.constant 0 : index
      %77 = vector.load %arg7[%c0_33, %c0_34] : memref<16x32xf32, #tpu.memory_space<vmem>>, vector<16x32xf32>
      %c0_35 = arith.constant 0 : index
      %c0_36 = arith.constant 0 : index
      %78 = vector.load %arg5[%c0_35, %c0_36] : memref<1x32xf32, #tpu.memory_space<vmem>>, vector<1x32xf32>
      %79 = vector.broadcast %78 : vector<1x32xf32> to vector<16x32xf32>
      %80 = arith.addf %77, %79 : vector<16x32xf32>
      %cst_37 = arith.constant -7.99975586 : f32
      %cst_38 = arith.constant 7.99975586 : f32
      %81 = vector.broadcast %cst_37 : f32 to vector<16x32xf32>
      %82 = arith.maximumf %81, %80 : vector<16x32xf32>
      %83 = vector.broadcast %cst_38 : f32 to vector<16x32xf32>
      %84 = arith.minimumf %83, %82 : vector<16x32xf32>
      %cst_39 = arith.constant 4.096000e+03 : f32
      %85 = vector.broadcast %cst_39 : f32 to vector<16x32xf32>
      %86 = arith.mulf %84, %85 : vector<16x32xf32>
      %87 = arith.fptosi %86 : vector<16x32xf32> to vector<16x32xi32>
      %88 = arith.sitofp %87 : vector<16x32xi32> to vector<16x32xf32>
      %cst_40 = arith.constant 2.44140625E-4 : f32
      %89 = vector.broadcast %cst_40 : f32 to vector<16x32xf32>
      %90 = arith.mulf %88, %89 : vector<16x32xf32>
      %91 = vector.shape_cast %90 : vector<16x32xf32> to vector<2x8x32xf32>
      %c0_41 = arith.constant 0 : index
      %c0_42 = arith.constant 0 : index
      %c0_43 = arith.constant 0 : index
      %92 = vector.load %arg6[%c0_41, %c0_42, %c0_43] : memref<2x8x32xf32, #tpu.memory_space<vmem>>, vector<2x8x32xf32>
      tpu.vector_store %arg6[%c0_41, %c0_42, %c0_43], %91 {strides = array<i32>} : memref<2x8x32xf32, #tpu.memory_space<vmem>>, vector<2x8x32xf32>,
    } else {
    }
    return
  }
  func.func @transform_0(%arg0: i32, %arg1: i32) -> (i32, i32, i32) {
    %c0_i32 = arith.constant 0 : i32
    %c0_i32_0 = arith.constant 0 : i32
    %c0_i32_1 = arith.constant 0 : i32
    return %arg0, %c0_i32, %c0_i32_0 : i32, i32, i32
  }
  func.func @transform_1(%arg0: i32, %arg1: i32) -> (i32, i32, i32) {
    %c0_i32 = arith.constant 0 : i32
    %c0_i32_0 = arith.constant 0 : i32
    %c0_i32_1 = arith.constant 0 : i32
    %c0_i32_2 = arith.constant 0 : i32
    return %c0_i32, %c0_i32_0, %c0_i32_1 : i32, i32, i32
  }
  func.func @transform_2(%arg0: i32, %arg1: i32) -> (i32, i32, i32) {
    %c0_i32 = arith.constant 0 : i32
    %c0_i32_0 = arith.constant 0 : i32
    %c0_i32_1 = arith.constant 0 : i32
    %c0_i32_2 = arith.constant 0 : i32
    return %c0_i32, %c0_i32_0, %c0_i32_1 : i32, i32, i32
  }
  func.func @transform_3(%arg0: i32, %arg1: i32) -> (i32, i32) {
    %c0_i32 = arith.constant 0 : i32
    %c0_i32_0 = arith.constant 0 : i32
    %c0_i32_1 = arith.constant 0 : i32
    return %c0_i32, %c0_i32_0 : i32, i32
  }
  func.func @transform_4(%arg0: i32, %arg1: i32) -> (i32, i32, i32) {
    %c0_i32 = arith.constant 0 : i32
    %c0_i32_0 = arith.constant 0 : i32
    %c0_i32_1 = arith.constant 0 : i32
    return %arg0, %c0_i32, %c0_i32_0 : i32, i32, i32
  }
}

</mosaic_0001>

<bundles_post_ra>
// kernel: tpu_custom_call.1
= control target key start
LH: loop header
LB: loop body
LE: loop exit
PB: predicated region body
PF: predicated region fallthrough
CT: control target
= control target key end

     0   :  { %9 = vsyncpa [#allocation4], 0  ;;  %s1581_s0 = inlined_call_operand.hbm [shape: f32[2,8,32], index: 0, kind: input, shape index: {}]   ;;  %s1582_s1 = inlined_call_operand.hbm [shape: f32[4,32,24], index: 1, kind: input, shape index: {}]   ;;  %s1583_s2 = inlined_call_operand.hbm [shape: f32[4,8,32], index: 2, kind: input, shape index: {}]   ;;  %s1584_s3 = inlined_call_operand.hbm [shape: f32[1,32], index: 3, kind: input, shape index: {}]   ;;  %s1585_s4 = inlined_call_operand.hbm [shape: f32[2,8,32], index: 4, kind: output, shape index: {}]  }
   0x1   :  { %10 = vsyncpa [#allocation7], 0 }
   0x2   :  { %11 = vsyncpa [#allocation10], 0 }
   0x3   :  { %12 = vsyncpa [#allocation5], 0  ;;  %s1365_s15 = smov 0   ;;  %s1367_s16 = smov 0  }
   0x4   :  { %s1369_s17 = smov 0  }
   0x5 LB: > { %s938_s18 = sadd.s32 4294967295, %s1324_s17   ;;  %p939_p0 = scmp.ge.s32.totalorder %s1324_s17, 1  ;;  %s1324_s17 = sphi %s1369_s17, %s18_s17   ;;  %s1320_s16 = sphi %s1367_s16, %s1598_s16   ;;  %s1316_s15 = sphi %s1365_s15, %s1597_s15  }
   0x6   : > { %p150_p1 = scmp.lt.s32.totalorder %s1324_s17, 5  ;;  %p1385_p2 = scmp.eq.s32.totalorder %s938_s18, 0 }
   0x7   : > { %s1326_s21 = smov [#allocation6]   ;;  %s27_s24 = sadd.s32 1, %s1320_s16 }
   0x8   : > { %s1589_s19 = scalar_select %p1385_p2, 1, 0 }
   0x9   : > { %p1389_p3 = pnand %p939_p0, %p150_p1  ;;  %s178_s22 = sshll.u32 %s1326_s21, 4  ;;  %s1393_s22 = int_to_ptr.vmem [resolvable:$true] %s178_s22 }
   0xa   : > { %p1404_p6 = scmp.ge.s32.totalorder %s27_s24, 4  ;;  %s1327_s26 = smov [#allocation3]  }
   0xb   : > { %s1590_s20 = scalar_select %p1389_p3, 1, 0 }
   0xc   : > { %p1079_p4 = pneg %p1389_p3  ;;  %s165_s27 = sshll.u32 %s1327_s26, 4  ;;  %s166_s27 = int_to_ptr.vmem [resolvable:$true] %s165_s27 }
   0xd   : > { %s1148_s30 = scalar_lea.hbm %s1582_s1, 2048 }
   0xe   : > { %p1399_p5 = pnand %p1385_p2, %p1079_p4  ;;  %p1149_p7 = scmp.ne.s32.totalorder %s1582_s1, %s1148_s30 }
   0xf   : > { %p1155_p11 = scmp.lt.u32.totalorder %s1148_s30, %s1582_s1 }
  0x10   : > { %p1416_p8 = pneg %p1399_p5 }
  0x12   : > { %p1151_p9 = pnand %p1416_p8, %p1149_p7 }
  0x14   : > { %p1152_p10 = pneg %p1151_p9 }
  0x16   : > { %p1157_p12 = pnand %p1155_p11, %p1152_p10 }
  0x18   : > { %1160 = shalt.err (!%p1157_p12)
}
  0x19   : > { %s1161_s10 = scalar_lea.vmem %s1393_s22, 2048  ;;  %p1169_p4 = scmp.lt.s32.totalorder %s1393_s22, %s1393_s22 }
  0x1a   : > { %p1162_p13 = scmp.ne.s32.totalorder %s1393_s22, %s1161_s10  ;;  %p1170_p2 = scmp.lt.s32.totalorder %s1161_s10, %s1161_s10 }
  0x1c   : > { %p1164_p0 = pnand %p1162_p13, %p1416_p8  ;;  %p1171_p7 = por %p1170_p2, %p1169_p4 }
  0x1e   : > { %p1165_p1 = pneg %p1164_p0 }
  0x20   : > { %p1172_p9 = pnand %p1171_p7, %p1165_p1 }
  0x22   : > { %1175 = shalt.err (!%p1172_p9)
}
  0x23   : > { %s1328_s11 = smov 128   ;;  %s1329_s12 = smov 8  }
  0x24   : > { %1085 = dma.hbm_to_vmem [thread:$0]  (!%p1399_p5), %s1582_s1, 2048, %s1393_s22, [#allocation7], %s1328_s11, %s1328_s11, %s1329_s12  }
  0x25   : > { %s1600_s24 = smov (%p1404_p6, %s27_s24), 0  ;;  %s1176_s28 = scalar_lea.hbm %s1581_s0, 256 }
  0x26   : > { %p1177_p2 = scmp.ne.s32.totalorder %s1581_s0, %s1176_s28  ;;  %p1183_p12 = scmp.lt.u32.totalorder %s1176_s28, %s1581_s0 }
  0x28   : > { %p1179_p10 = pnand %p1177_p2, %p1416_p8 }
  0x2a   : > { %p1180_p11 = pneg %p1179_p10 }
  0x2c   : > { %p1185_p13 = pnand %p1183_p12, %p1180_p11 }
  0x2e   : > { %1188 = shalt.err (!%p1185_p13)
}
  0x2f   : > { %s1189_s22 = scalar_lea.vmem %s166_s27, 256  ;;  %p1197_p4 = scmp.lt.s32.totalorder %s166_s27, %s166_s27 }
  0x30   : > { %p1190_p6 = scmp.ne.s32.totalorder %s166_s27, %s1189_s22  ;;  %p1198_p7 = scmp.lt.s32.totalorder %s1189_s22, %s1189_s22 }
  0x32   : > { %p1192_p0 = pnand %p1190_p6, %p1416_p8  ;;  %p1199_p9 = por %p1198_p7, %p1197_p4 }
  0x34   : > { %p1193_p1 = pneg %p1192_p0 }
  0x36   : > { %p1200_p3 = pnand %p1199_p9, %p1193_p1 }
  0x38   : > { %1203 = shalt.err (!%p1200_p3)
}
  0x39   : > { %1082 = dma.hbm_to_vmem [thread:$0]  (!%p1399_p5), %s1581_s0, 256, %s166_s27, [#allocation4], %s1328_s11, %s1328_s11, %s1329_s12  }
  0x3a   : > { %s1330_s9 = smov [#allocation8]   ;;  %s1331_s13 = smov [#allocation9]  }
  0x3b   : > { %s191_s10 = sshll.u32 %s1330_s9, 4  ;;  %s205_s14 = sshll.u32 %s1331_s13, 4  ;;  %s192_s10 = int_to_ptr.vmem [resolvable:$true] %s191_s10  ;;  %s206_s14 = int_to_ptr.vmem [resolvable:$true] %s205_s14 }
  0x3c   : > { %s1204_s28 = scalar_lea.hbm %s1583_s2, 512 }
  0x3d   : > { %p1205_p3 = scmp.ne.s32.totalorder %s1583_s2, %s1204_s28  ;;  %p1211_p11 = scmp.lt.u32.totalorder %s1204_s28, %s1583_s2 }
  0x3f   : > { %p1207_p2 = pnand %p1205_p3, %p1416_p8 }
  0x41   : > { %p1208_p10 = pneg %p1207_p2 }
  0x43   : > { %p1213_p12 = pnand %p1211_p11, %p1208_p10 }
  0x45   : > { %1216 = shalt.err (!%p1213_p12)
}
  0x46   : > { %s1217_s27 = scalar_lea.vmem %s192_s10, 512  ;;  %p1225_p1 = scmp.lt.s32.totalorder %s192_s10, %s192_s10 }
  0x47   : > { %p1218_p13 = scmp.ne.s32.totalorder %s192_s10, %s1217_s27  ;;  %p1226_p4 = scmp.lt.s32.totalorder %s1217_s27, %s1217_s27 }
  0x49   : > { %p1220_p6 = pnand %p1218_p13, %p1416_p8  ;;  %p1227_p7 = por %p1226_p4, %p1225_p1 }
  0x4b   : > { %p1221_p0 = pneg %p1220_p6 }
  0x4d   : > { %p1228_p9 = pnand %p1227_p7, %p1221_p0 }
  0x4f   : > { %1231 = shalt.err (!%p1228_p9)
}
  0x50   : > { %1088 = dma.hbm_to_vmem [thread:$0]  (!%p1399_p5), %s1583_s2, 512, %s192_s10, [#allocation7], %s1328_s11, %s1328_s11, %s1329_s12  }
  0x51   : > { %s1232_s13 = scalar_lea.hbm %s1584_s3, 16 }
  0x52   : > { %p1233_p3 = scmp.ne.s32.totalorder %s1584_s3, %s1232_s13  ;;  %p1239_p11 = scmp.lt.u32.totalorder %s1232_s13, %s1584_s3 }
  0x54   : > { %p1235_p2 = pnand %p1233_p3, %p1416_p8 }
  0x56   : > { %p1236_p10 = pneg %p1235_p2 }
  0x58   : > { %p1241_p12 = pnand %p1239_p11, %p1236_p10 }
  0x5a   : > { %1244 = shalt.err (!%p1241_p12)
}
  0x5b   : > { %s1245_s30 = scalar_lea.vmem %s206_s14, 16  ;;  %s1252_s11 = scalar_lea.vmem %s206_s14, 32 }
  0x5c   : > { %p1246_p13 = scmp.ne.s32.totalorder %s206_s14, %s1245_s30  ;;  %p1253_p1 = scmp.lt.s32.totalorder %s206_s14, %s206_s14 }
  0x5d   : > { %p1254_p4 = scmp.lt.s32.totalorder %s1252_s11, %s1245_s30 }
  0x5e   : > { %p1248_p6 = pnand %p1246_p13, %p1416_p8 }
  0x5f   : > { %p1255_p7 = por %p1254_p4, %p1253_p1 }
  0x60   : > { %p1249_p0 = pneg %p1248_p6 }
  0x62   : > { %p1256_p9 = pnand %p1255_p7, %p1249_p0 }
  0x64   : > { %1259 = shalt.err (!%p1256_p9)
}
  0x65   : > { %1091 = dma.hbm_to_vmem [thread:$0]  (!%p1399_p5), %s1584_s3, 16, %s206_s14, [#allocation10]  }
  0x66   : > { %p1594_p3 = scmp.ne.s32.totalorder %s1590_s20, 0 }
  0x67   : > { %p1595_p2 = scmp.ne.s32.totalorder (!%p1594_p3), %s1589_s19, 0 }
  0x68   : > { %218 = sbr.rel (%p1594_p3) target bundleno = 1523 (0x5f3), region = 36 }
  0x6f   : > { %1299 = dma.done.wait (%p1595_p2), [#allocation4], 256  }
  0x70   : > { %1301 = vsyncadd (%p1595_p2), [#allocation4], 4294967040 }
  0x71   : > { %1303 = dma.done.wait (%p1595_p2), [#allocation7], 2560  }
  0x72   : > { %1305 = vsyncadd (%p1595_p2), [#allocation7], 4294964736 }
  0x73   : > { %1307 = dma.done.wait (%p1595_p2), [#allocation10], 16  }
  0x74   : > { %1309 = vsyncadd (%p1595_p2), [#allocation10], 4294967280  ;;  %p949_p5 = scmp.ne.s32.totalorder %s1316_s15, 0 }
  0x75   : > { %vm252_vm0 = vcmask (!%p949_p5), 261120   ;;  %v1332_v0 = vmov (!%p949_p5), 0.0  }
  0x76   : > { %251 = sbr.rel (%p949_p5) target bundleno = 125 (0x7d), region = 56  ;;  %253 = vst.msk [vmem:[#allocation2] sm:$0xff] (!%p949_p5), %vm252_vm0, %v1332_v0  ;;  %254 = vst.msk [vmem:[#allocation2 + $0x8] sm:$0xff] (!%p949_p5), %vm252_vm0, %v1332_v0 }
  0x7d PF: > { %s950_s20 = sshll.u32 %s1316_s15, 5  ;;  %v255_v1 = vld [vmem:[#allocation3] sm:$0xff]  ;;  %vm268_vm1 = vcmask 261120   ;;  %v256_v8 = vld [vmem:[#allocation3 + $0x8] sm:$0xff]  ;;  %v1333_v9 = vmov 0.0   ;;  %vm1334_vm2 = vmmov 0  }
  0x7e   : > { %1003 = vmatprep.mubr.msk.f32.mxu0 %vm268_vm1, %v255_v1  ;;  %s260_s23 = scalar_lea.vmem [#allocation6], %s950_s20  ;;  %1006 = vmatprep.subr.mxu1 %v1333_v9  ;;  %s1335_s19 = smov 120   ;;  %vm365_vm3 = vcmask 64512  }
  0x7f   : > { %v261_v2 = vld [vmem:[%s260_s23] sm:$0xff]  ;;  %v262_v3 = vld [vmem:[%s260_s23 + $0x8] sm:$0xff]  ;;  %v263_v4 = vld [vmem:[%s260_s23 + $0x10] sm:$0xff]  ;;  %1008 = vmatprep.mubr.msk.f32.mxu1 %vm1334_vm2, %v1333_v9  ;;  %s1336_s7 = smov 112   ;;  %s951_s14 = sshll.u32 %s1316_s15, 3 }
  0x80   : > { %v1031_v5 = vpack.c.bf16 %v262_v3, %v261_v2  ;;  %v264_v6 = vld [vmem:[%s260_s23 + $0x18] sm:$0xff]  ;;  %s266_s5 = scalar_lea.vmem [#allocation8], %s951_s14  ;;  %p970_p8 = scmp.ne.s32.totalorder %s1316_s15, 3 }
  0x81   : > { %v1035_v7 = vpack.c.bf16 %v264_v6, %v263_v4 }
  0x82   : > { %1032 = vmatprep.subr.bf16.mxu0 %v1031_v5 }
  0x83   : > { %1034 = vmatpush3.bf16.msra.mxu0 %v1031_v5 }
  0x84   : > { %1036 = vmatprep.subr.bf16.mxu0 %v1035_v7 }
  0x87   : > { %1038 = vmatpush3.bf16.msra.mxu0 %v1035_v7 }
  0x88   : > { %1016 = vmatprep.subr.mxu0 %v1333_v9 }
  0x8a   : > { %1004 = vmatmul.mubr.msk.f32.vlgmr.msra.gmra.mrb[0].mxu0 %vm268_vm1, %v256_v8 }
  0x8b   : > { %1018 = vmatprep.mubr.msk.f32.mxu0 %vm1334_vm2, %v1333_v9 }
 0x15d   : > { %v1005_v10 = vpop.f32.mrb[0].mxu0 }
 0x15e   : > { %v955_v11 = vclamps-f32 %v1005_v10, 7.999756  ;;  %v341_v12 = vpop.f32.mrb[1].mxu0  ;;  %v267_v10 = vld [vmem:[%s266_s5] sm:$0xff] }
 0x15f   : > { %v954_v13 = vclamps-f32 %v341_v12, 7.999756 }
 0x160   : > { %v355_v14 = vmul.f32 4096.0, %v955_v11 }
 0x161   : > { %v354_v15 = vmul.f32 4096.0, %v954_v13 }
 0x162   : > { %v1041_v16 = vtrunc.f32 %v355_v14 }
 0x163   : > { %v1039_v17 = vtrunc.f32 %v354_v15 }
 0x164   : > { %v1042_v18 = vcvt.f32.s32 %v1041_v16 }
 0x165   : > { %v1040_v19 = vcvt.f32.s32 %v1039_v17 }
 0x166   : > { %v359_v21 = vcvt.s32.f32 %v1042_v18 }
 0x167   : > { %v358_v20 = vcvt.s32.f32 %v1040_v19 }
 0x168   : > { %v361_v23 = vmul.f32 0.00024414063, %v359_v21 }
 0x169   : > { %v360_v22 = vmul.f32 0.00024414063, %v358_v20 }
 0x16b   : > { %363 = vrot.lane.b32.xlu0 %v360_v22, %s1335_s19 }
 0x16f   : > { %441 = vrot.lane.b32.xlu0 %v361_v23, %s1335_s19 }
 0x1dd   : > { %v364_v24 = vpop.permute.xlu0 %363 }
 0x1de   : > { %1007 = vmatpush3.xpose.msk.msra.mxu1 %vm365_vm3, %v364_v24 }
 0x1df   : > { %1011 = vmatprep.subr.mxu1 %v1333_v9 }
 0x1e1   : > { %1009 = vmatmul.mubr.msk.f32.vlgmr.msra.gmra.mrb[0].mxu1 %vm365_vm3, %v360_v22  ;;  %v442_v25 = vpop.permute.xlu0 %441 }
 0x1e2   : > { %1012 = vmatpush3.xpose.msk.msra.mxu1 %vm365_vm3, %v442_v25  ;;  %1013 = vmatprep.mubr.msk.f32.mxu1 %vm1334_vm2, %v1333_v9 }
 0x1e3   : > { %1021 = vmatprep.subr.mxu1 %v1333_v9 }
 0x1e5   : > { %1014 = vmatmul.mubr.msk.f32.vlgmr.msra.gmra.mrb[2].mxu1 %vm365_vm3, %v361_v23 }
 0x1e6   : > { %1023 = vmatprep.mubr.msk.f32.mxu1 %vm1334_vm2, %v1333_v9 }
 0x2b4   : > { %v436_v26 = vpop.f32.mrb[0].mxu1 }
 0x2b5   : > { %v517_v27 = vmul.f32 1448.1547, %v436_v26  ;;  %v1010_v28 = vpop.f32.mrb[1].mxu1 }
 0x2b6   : > { %v257_v28 = vld [vmem:[#allocation2] sm:$0xff] }
 0x2b7   : > { %v960_v29 = vclamps-f32 %v517_v27, 32767.0  ;;  %v258_v27 = vld [vmem:[#allocation2 + $0x8] sm:$0xff] }
 0x2b8   : > { %v513_v30 = vpop.f32.mrb[2].mxu1 }
 0x2b9   : > { %v1043_v31 = vtrunc.f32 %v960_v29  ;;  %v518_v32 = vmul.f32 1448.1547, %v513_v30  ;;  %v1015_v33 = vpop.f32.mrb[3].mxu1 }
 0x2bb   : > { %v1044_v34 = vcvt.f32.s32 %v1043_v31  ;;  %v961_v35 = vclamps-f32 %v518_v32, 32767.0 }
 0x2bd   : > { %v1045_v36 = vtrunc.f32 %v961_v35  ;;  %v525_v37 = vcvt.s32.f32 %v1044_v34  ;;  %v971_v34 = vld [vmem:[#allocation9] ss:$0 sm:$0xff] (!%p970_p8) }
 0x2bf   : > { %v1046_v38 = vcvt.f32.s32 %v1045_v36  ;;  %v527_v39 = vmul.f32 0.00024414063, %v525_v37 }
 0x2c1   : > { %v526_v40 = vcvt.s32.f32 %v1046_v38  ;;  %v529_v41 = vsel %vm365_vm3, %v527_v39, -inf }
 0x2c2   : > { %530 = vmax.xlane.f32.xlu1 %v529_v41 }
 0x2c3   : > { %v528_v42 = vmul.f32 0.00024414063, %v526_v40 }
 0x2c5   : > { %v532_v43 = vsel %vm365_vm3, %v528_v42, -inf }
 0x2c6   : > { %533 = vmax.xlane.f32.xlu1 %v532_v43 }
 0x34f   : > { %v531_v44 = vpop.xlane.xlu1 %530 }
 0x350   : > { %v535_v45 = vsub.f32 %v527_v39, %v531_v44 }
 0x352   : > { %v537_v46 = vmul.f32 1.442695, %v535_v45 }
 0x353   : > { %v534_v47 = vpop.xlane.xlu1 %533 }
 0x354   : > { %1140 = vpow2.f32 %v537_v46  ;;  %v536_v48 = vsub.f32 %v528_v42, %v534_v47 }
 0x356   : > { %v539_v49 = vmul.f32 1.442695, %v536_v48 }
 0x358   : > { %1142 = vpow2.f32 %v539_v49 }
 0x35e   : > { %v1141_v50 = vpop.eup %1140 }
 0x35f   : > { %v541_v51 = vsel %vm365_vm3, %v1141_v50, 0.0 }
 0x360   : > { %542 = vadd.xlane.f32.xlu0 %v541_v51 }
 0x362   : > { %v1143_v52 = vpop.eup %1142 }
 0x363   : > { %v544_v53 = vsel %vm365_vm3, %v1143_v52, 0.0 }
 0x364   : > { %545 = vadd.xlane.f32.xlu1 %v544_v53 }
 0x375   : > { %563 = vrot.lane.b32.xlu1 %v360_v22, %s1336_s7 }
 0x379   : > { %639 = vrot.lane.b32.xlu1 %v361_v23, %s1336_s7 }
 0x3ed   : > { %v543_v54 = vpop.xlane.xlu0 %542 }
 0x3ee   : > { %1144 = vrcp.f32 %v543_v54 }
 0x3f1   : > { %v546_v55 = vpop.xlane.xlu1 %545 }
 0x3f2   : > { %1146 = vrcp.f32 %v546_v55 }
 0x3f5   : > { %v564_v56 = vpop.permute.xlu1 %563 }
 0x3f6   : > { %1017 = vmatpush3.msra.mxu0 %v564_v56 }
 0x3f7   : > { %1026 = vmatprep.subr.mxu0 %v267_v10 }
 0x3f8   : > { %v1145_v57 = vpop.eup %1144 }
 0x3f9   : > { %v548_v58 = vmul.f32 %v1145_v57, %v1141_v50  ;;  %v640_v59 = vpop.permute.xlu1 %639 }
 0x3fa   : > { %1022 = vmatpush3.msra.mxu1 %v640_v59 }
 0x3fb   : > { %v962_v60 = vclamps-f32 %v548_v58, 7.999756 }
 0x3fc   : > { %v1147_v61 = vpop.eup %1146 }
 0x3fd   : > { %v555_v62 = vmul.f32 4096.0, %v962_v60  ;;  %v550_v63 = vmul.f32 %v1147_v61, %v1143_v52 }
 0x3ff   : > { %v1047_v0 = vtrunc.f32 %v555_v62  ;;  %v963_v1 = vclamps-f32 %v550_v63, 7.999756 }
 0x401   : > { %v1048_v2 = vcvt.f32.s32 %v1047_v0  ;;  %v556_v3 = vmul.f32 4096.0, %v963_v1 }
 0x403   : > { %v1049_v4 = vtrunc.f32 %v556_v3  ;;  %v559_v5 = vcvt.s32.f32 %v1048_v2 }
 0x405   : > { %v561_v6 = vmul.f32 0.00024414063, %v559_v5  ;;  %v1050_v7 = vcvt.f32.s32 %v1049_v4 }
 0x407   : > { %1019 = vmatmul.mubr.msk.f32.vlgmr.msra.gmra.mrb[2].mxu0 %vm365_vm3, %v561_v6  ;;  %v560_v8 = vcvt.s32.f32 %v1050_v7 }
 0x408   : > { %1027 = vmatpush3.msra.mxu0 %v267_v10 }
 0x409   : > { %v562_v9 = vmul.f32 0.00024414063, %v560_v8 }
 0x40b   : > { %1024 = vmatmul.mubr.msk.f32.vlgmr.msra.gmra.mrb[4].mxu1 %vm365_vm3, %v562_v9 }
 0x4da   : > { %v635_v11 = vpop.f32.mrb[2].mxu0 }
 0x4db   : > { %v966_v12 = vclamps-f32 %v635_v11, 7.999756  ;;  %v1020_v13 = vpop.f32.mrb[3].mxu0 }
 0x4dd   : > { %v719_v14 = vmul.f32 4096.0, %v966_v12 }
 0x4de   : > { %v711_v15 = vpop.f32.mrb[4].mxu1 }
 0x4df   : > { %v1051_v16 = vtrunc.f32 %v719_v14  ;;  %v967_v17 = vclamps-f32 %v711_v15, 7.999756  ;;  %v1025_v18 = vpop.f32.mrb[5].mxu1 }
 0x4e1   : > { %v1052_v19 = vcvt.f32.s32 %v1051_v16  ;;  %v720_v20 = vmul.f32 4096.0, %v967_v17 }
 0x4e3   : > { %v723_v21 = vcvt.s32.f32 %v1052_v19  ;;  %v1053_v22 = vtrunc.f32 %v720_v20 }
 0x4e5   : > { %v725_v23 = vmul.f32 0.00024414063, %v723_v21  ;;  %v1054_v24 = vcvt.f32.s32 %v1053_v22 }
 0x4e7   : > { %v724_v25 = vcvt.s32.f32 %v1054_v24  ;;  %1028 = vmatprep.mubr.msk.f32.mxu0 %vm365_vm3, %v725_v23 }
 0x4e9   : > { %v726_v26 = vmul.f32 0.00024414063, %v724_v25 }
 0x4eb   : > { %1029 = vmatmul.mubr.msk.f32.vlgmr.msra.gmra.mrb[4].mxu0 %vm365_vm3, %v726_v26 }
 0x5bc   : > { %815 = sbr.rel (%p970_p8) target bundleno = 1497 (0x5d9), region = 60 }
 0x5be   : > { %v1030_v29 = vpop.f32.mrb[4].mxu0 }
 0x5bf   : > { %v809_v30 = vadd.f32 %v1030_v29, %v258_v27  ;;  %v799_v31 = vpop.f32.mrb[5].mxu0 }
 0x5c0   : > { %v808_v32 = vadd.f32 %v799_v31, %v257_v28 }
 0x5c1   : > { %811 = vst.msk [vmem:[#allocation2 + $0x8] sm:$0xff] %vm268_vm1, %v809_v30 }
 0x5c2   : > { %810 = vst.msk [vmem:[#allocation2] sm:$0xff] %vm268_vm1, %v808_v32 }
 0x5c8   : > { %v817_v35 = vld [vmem:[#allocation2 + $0x8] sm:$0xff] }
 0x5c9   : > { %v816_v33 = vld [vmem:[#allocation2] sm:$0xff]  ;;  %v826_v37 = vadd.f32 %v971_v34, %v817_v35 }
 0x5ca   : > { %v825_v36 = vadd.f32 %v971_v34, %v816_v33 }
 0x5cb   : > { %v973_v39 = vclamps-f32 %v826_v37, 7.999756 }
 0x5cc   : > { %v972_v38 = vclamps-f32 %v825_v36, 7.999756 }
 0x5cd   : > { %v832_v41 = vmul.f32 4096.0, %v973_v39 }
 0x5ce   : > { %v831_v40 = vmul.f32 4096.0, %v972_v38 }
 0x5cf   : > { %v1057_v43 = vtrunc.f32 %v832_v41 }
 0x5d0   : > { %v1055_v42 = vtrunc.f32 %v831_v40 }
 0x5d1   : > { %v1058_v45 = vcvt.f32.s32 %v1057_v43 }
 0x5d2   : > { %v1056_v44 = vcvt.f32.s32 %v1055_v42 }
 0x5d3   : > { %v836_v47 = vcvt.s32.f32 %v1058_v45 }
 0x5d4   : > { %v835_v46 = vcvt.s32.f32 %v1056_v44 }
 0x5d5   : > { %v838_v49 = vmul.f32 0.00024414063, %v836_v47 }
 0x5d6   : > { %v837_v48 = vmul.f32 0.00024414063, %v835_v46 }
 0x5d7   : > { %840 = vst.msk [vmem:[#allocation11 + $0x8] sm:$0xff] %vm268_vm1, %v838_v49 }
 0x5d8   : > { %839 = vst.msk [vmem:[#allocation11] sm:$0xff] %vm268_vm1, %v837_v48 }
 0x5d9 PF: > { %p1546_p10 = scmp.eq.s32.totalorder %s938_s18, 3  ;;  %s1337_s6 = smov [#allocation11]  }
 0x5da   : > { %s850_s27 = sshll.u32 %s1337_s6, 4  ;;  %s851_s27 = int_to_ptr.vmem [resolvable:$true] %s850_s27 }
 0x5db   : > { %s1260_s22 = scalar_lea.vmem %s851_s27, 256  ;;  %p1267_p6 = scmp.lt.s32.totalorder %s851_s27, %s851_s27 }
 0x5dc   : > { %p1261_p11 = scmp.ne.s32.totalorder %s851_s27, %s1260_s22  ;;  %p1268_p0 = scmp.lt.s32.totalorder %s1260_s22, %s1260_s22 }
 0x5de   : > { %p1262_p12 = pnand %p1261_p11, %p1546_p10  ;;  %p1269_p1 = por %p1268_p0, %p1267_p6 }
 0x5e0   : > { %p1263_p13 = pneg %p1262_p12 }
 0x5e2   : > { %p1270_p4 = pnand %p1269_p1, %p1263_p13 }
 0x5e4   : > { %1273 = shalt.err (!%p1270_p4)
}
 0x5e5   : > { %s1274_s18 = scalar_lea.hbm %s1585_s4, 256 }
 0x5e6   : > { %p1275_p7 = scmp.ne.s32.totalorder %s1585_s4, %s1274_s18  ;;  %p1280_p2 = scmp.lt.u32.totalorder %s1274_s18, %s1585_s4 }
 0x5e8   : > { %p1276_p9 = pnand %p1275_p7, %p1546_p10 }
 0x5ea   : > { %p1277_p3 = pneg %p1276_p9 }
 0x5ec   : > { %p1282_p5 = pnand %p1280_p2, %p1277_p3 }
 0x5ee   : > { %1285 = shalt.err (!%p1282_p5)
}
 0x5ef   : > { %s1338_s28 = smov 128   ;;  %s1339_s29 = smov 8  }
 0x5f0   : > { %1076 = dma.vmem_to_hbm [thread:$0]  (%p1546_p10), %s851_s27, 256, %s1585_s4, [#allocation5], %s1338_s28, %s1338_s28, %s1339_s29  }
 0x5f1   : > { %1311 = dma.done.wait (%p1546_p10), [#allocation5], 256  }
 0x5f2   : > { %1313 = vsyncadd (%p1546_p10), [#allocation5], 4294967040 }
 0x5f3 PF: > { %s18_s17 = sadd.s32 1, %s1324_s17   ;;  %s1597_s15 = smov %s1320_s16 }
 0x5f4   : > { %p15_p8 = scmp.ge.s32.totalorder %s18_s17, 6   ;;  %s1598_s16 = smov %s1600_s24 }
 0x5f6   :  { %17 = sbr.rel (!%p15_p8) target bundleno = 5 (0x5), region = 89 }
 0x5fd   :  { %866 = vsyncpa [#allocation4], 1 }
 0x5fe   :  { %868 = vsyncpa [#allocation4 + $0x1], 1 }
 0x5ff   :  { %869 = vsyncpa [#allocation7], 1 }
 0x600   :  { %870 = vsyncpa [#allocation10], 1 }
 0x601   :  { %871 = vsyncpa [#allocation5], 1 }
 0x602   :  { %873 = vsyncpa [#allocation5 + $0x1], 1 }

// kernel: tpu_custom_call.1
= control target key start
LH: loop header
LB: loop body
LE: loop exit
PB: predicated region body
PF: predicated region fallthrough
CT: control target
= control target key end

     0   :  { %9 = vsyncpa [#allocation4], 0  ;;  %s1581_s0 = inlined_call_operand.hbm [shape: f32[2,8,32], index: 0, kind: input, shape index: {}]   ;;  %s1582_s1 = inlined_call_operand.hbm [shape: f32[4,32,24], index: 1, kind: input, shape index: {}]   ;;  %s1583_s2 = inlined_call_operand.hbm [shape: f32[4,8,32], index: 2, kind: input, shape index: {}]   ;;  %s1584_s3 = inlined_call_operand.hbm [shape: f32[1,32], index: 3, kind: input, shape index: {}]   ;;  %s1585_s4 = inlined_call_operand.hbm [shape: f32[2,8,32], index: 4, kind: output, shape index: {}]  }
   0x1   :  { %10 = vsyncpa [#allocation7], 0 }
   0x2   :  { %11 = vsyncpa [#allocation10], 0 }
   0x3   :  { %12 = vsyncpa [#allocation5], 0  ;;  %s1365_s15 = smov 0   ;;  %s1367_s16 = smov 0  }
   0x4   :  { %s1369_s17 = smov 0  }
   0x5 LB: > { %s938_s18 = sadd.s32 4294967295, %s1324_s17   ;;  %p939_p0 = scmp.ge.s32.totalorder %s1324_s17, 1  ;;  %s1324_s17 = sphi %s1369_s17, %s18_s17   ;;  %s1320_s16 = sphi %s1367_s16, %s1598_s16   ;;  %s1316_s15 = sphi %s1365_s15, %s1597_s15  }
   0x6   : > { %p150_p1 = scmp.lt.s32.totalorder %s1324_s17, 5  ;;  %p1385_p2 = scmp.eq.s32.totalorder %s938_s18, 0 }
   0x7   : > { %s1326_s21 = smov [#allocation6]   ;;  %s27_s24 = sadd.s32 1, %s1320_s16 }
   0x8   : > { %s1589_s19 = scalar_select %p1385_p2, 1, 0 }
   0x9   : > { %p1389_p3 = pnand %p939_p0, %p150_p1  ;;  %s178_s22 = sshll.u32 %s1326_s21, 4  ;;  %s1393_s22 = int_to_ptr.vmem [resolvable:$true] %s178_s22 }
   0xa   : > { %p1404_p6 = scmp.ge.s32.totalorder %s27_s24, 4  ;;  %s1327_s26 = smov [#allocation3]  }
   0xb   : > { %s1590_s20 = scalar_select %p1389_p3, 1, 0 }
   0xc   : > { %p1079_p4 = pneg %p1389_p3  ;;  %s165_s27 = sshll.u32 %s1327_s26, 4  ;;  %s166_s27 = int_to_ptr.vmem [resolvable:$true] %s165_s27 }
   0xd   : > { %s1148_s30 = scalar_lea.hbm %s1582_s1, 2048 }
   0xe   : > { %p1399_p5 = pnand %p1385_p2, %p1079_p4  ;;  %p1149_p7 = scmp.ne.s32.totalorder %s1582_s1, %s1148_s30 }
   0xf   : > { %p1155_p11 = scmp.lt.u32.totalorder %s1148_s30, %s1582_s1 }
  0x10   : > { %p1416_p8 = pneg %p1399_p5 }
  0x12   : > { %p1151_p9 = pnand %p1416_p8, %p1149_p7 }
  0x14   : > { %p1152_p10 = pneg %p1151_p9 }
  0x16   : > { %p1157_p12 = pnand %p1155_p11, %p1152_p10 }
  0x18   : > { %1160 = shalt.err (!%p1157_p12)
}
  0x19   : > { %s1161_s10 = scalar_lea.vmem %s1393_s22, 2048  ;;  %p1169_p4 = scmp.lt.s32.totalorder %s1393_s22, %s1393_s22 }
  0x1a   : > { %p1162_p13 = scmp.ne.s32.totalorder %s1393_s22, %s1161_s10  ;;  %p1170_p2 = scmp.lt.s32.totalorder %s1161_s10, %s1161_s10 }
  0x1c   : > { %p1164_p0 = pnand %p1162_p13, %p1416_p8  ;;  %p1171_p7 = por %p1170_p2, %p1169_p4 }
  0x1e   : > { %p1165_p1 = pneg %p1164_p0 }
  0x20   : > { %p1172_p9 = pnand %p1171_p7, %p1165_p1 }
  0x22   : > { %1175 = shalt.err (!%p1172_p9)
}
  0x23   : > { %s1328_s11 = smov 128   ;;  %s1329_s12 = smov 8  }
  0x24   : > { %1085 = dma.hbm_to_vmem [thread:$0]  (!%p1399_p5), %s1582_s1, 2048, %s1393_s22, [#allocation7], %s1328_s11, %s1328_s11, %s1329_s12  }
  0x25   : > { %s1600_s24 = smov (%p1404_p6, %s27_s24), 0  ;;  %s1176_s28 = scalar_lea.hbm %s1581_s0, 256 }
  0x26   : > { %p1177_p2 = scmp.ne.s32.totalorder %s1581_s0, %s1176_s28  ;;  %p1183_p12 = scmp.lt.u32.totalorder %s1176_s28, %s1581_s0 }
  0x28   : > { %p1179_p10 = pnand %p1177_p2, %p1416_p8 }
  0x2a   : > { %p1180_p11 = pneg %p1179_p10 }
  0x2c   : > { %p1185_p13 = pnand %p1183_p12, %p1180_p11 }
  0x2e   : > { %1188 = shalt.err (!%p1185_p13)
}
  0x2f   : > { %s1189_s22 = scalar_lea.vmem %s166_s27, 256  ;;  %p1197_p4 = scmp.lt.s32.totalorder %s166_s27, %s166_s27 }
  0x30   : > { %p1190_p6 = scmp.ne.s32.totalorder %s166_s27, %s1189_s22  ;;  %p1198_p7 = scmp.lt.s32.totalorder %s1189_s22, %s1189_s22 }
  0x32   : > { %p1192_p0 = pnand %p1190_p6, %p1416_p8  ;;  %p1199_p9 = por %p1198_p7, %p1197_p4 }
  0x34   : > { %p1193_p1 = pneg %p1192_p0 }
  0x36   : > { %p1200_p3 = pnand %p1199_p9, %p1193_p1 }
  0x38   : > { %1203 = shalt.err (!%p1200_p3)
}
  0x39   : > { %1082 = dma.hbm_to_vmem [thread:$0]  (!%p1399_p5), %s1581_s0, 256, %s166_s27, [#allocation4], %s1328_s11, %s1328_s11, %s1329_s12  }
  0x3a   : > { %s1330_s9 = smov [#allocation8]   ;;  %s1331_s13 = smov [#allocation9]  }
  0x3b   : > { %s191_s10 = sshll.u32 %s1330_s9, 4  ;;  %s205_s14 = sshll.u32 %s1331_s13, 4  ;;  %s192_s10 = int_to_ptr.vmem [resolvable:$true] %s191_s10  ;;  %s206_s14 = int_to_ptr.vmem [resolvable:$true] %s205_s14 }
  0x3c   : > { %s1204_s28 = scalar_lea.hbm %s1583_s2, 512 }
  0x3d   : > { %p1205_p3 = scmp.ne.s32.totalorder %s1583_s2, %s1204_s28  ;;  %p1211_p11 = scmp.lt.u32.totalorder %s1204_s28, %s1583_s2 }
  0x3f   : > { %p1207_p2 = pnand %p1205_p3, %p1416_p8 }
  0x41   : > { %p1208_p10 = pneg %p1207_p2 }
  0x43   : > { %p1213_p12 = pnand %p1211_p11, %p1208_p10 }
  0x45   : > { %1216 = shalt.err (!%p1213_p12)
}
  0x46   : > { %s1217_s27 = scalar_lea.vmem %s192_s10, 512  ;;  %p1225_p1 = scmp.lt.s32.totalorder %s192_s10, %s192_s10 }
  0x47   : > { %p1218_p13 = scmp.ne.s32.totalorder %s192_s10, %s1217_s27  ;;  %p1226_p4 = scmp.lt.s32.totalorder %s1217_s27, %s1217_s27 }
  0x49   : > { %p1220_p6 = pnand %p1218_p13, %p1416_p8  ;;  %p1227_p7 = por %p1226_p4, %p1225_p1 }
  0x4b   : > { %p1221_p0 = pneg %p1220_p6 }
  0x4d   : > { %p1228_p9 = pnand %p1227_p7, %p1221_p0 }
  0x4f   : > { %1231 = shalt.err (!%p1228_p9)
}
  0x50   : > { %1088 = dma.hbm_to_vmem [thread:$0]  (!%p1399_p5), %s1583_s2, 512, %s192_s10, [#allocation7], %s1328_s11, %s1328_s11, %s1329_s12  }
  0x51   : > { %s1232_s13 = scalar_lea.hbm %s1584_s3, 16 }
  0x52   : > { %p1233_p3 = scmp.ne.s32.totalorder %s1584_s3, %s1232_s13  ;;  %p1239_p11 = scmp.lt.u32.totalorder %s1232_s13, %s1584_s3 }
  0x54   : > { %p1235_p2 = pnand %p1233_p3, %p1416_p8 }
  0x56   : > { %p1236_p10 = pneg %p1235_p2 }
  0x58   : > { %p1241_p12 = pnand %p1239_p11, %p1236_p10 }
  0x5a   : > { %1244 = shalt.err (!%p1241_p12)
}
  0x5b   : > { %s1245_s30 = scalar_lea.vmem %s206_s14, 16  ;;  %s1252_s11 = scalar_lea.vmem %s206_s14, 32 }
  0x5c   : > { %p1246_p13 = scmp.ne.s32.totalorder %s206_s14, %s1245_s30  ;;  %p1253_p1 = scmp.lt.s32.totalorder %s206_s14, %s206_s14 }
  0x5d   : > { %p1254_p4 = scmp.lt.s32.totalorder %s1252_s11, %s1245_s30 }
  0x5e   : > { %p1248_p6 = pnand %p1246_p13, %p1416_p8 }
  0x5f   : > { %p1255_p7 = por %p1254_p4, %p1253_p1 }
  0x60   : > { %p1249_p0 = pneg %p1248_p6 }
  0x62   : > { %p1256_p9 = pnand %p1255_p7, %p1249_p0 }
  0x64   : > { %1259 = shalt.err (!%p1256_p9)
}
  0x65   : > { %1091 = dma.hbm_to_vmem [thread:$0]  (!%p1399_p5), %s1584_s3, 16, %s206_s14, [#allocation10]  }
  0x66   : > { %p1594_p3 = scmp.ne.s32.totalorder %s1590_s20, 0 }
  0x67   : > { %p1595_p2 = scmp.ne.s32.totalorder (!%p1594_p3), %s1589_s19, 0 }
  0x68   : > { %218 = sbr.rel (%p1594_p3) target bundleno = 1523 (0x5f3), region = 36 }
  0x6f   : > { %1299 = dma.done.wait (%p1595_p2), [#allocation4], 256  }
  0x70   : > { %1301 = vsyncadd (%p1595_p2), [#allocation4], 4294967040 }
  0x71   : > { %1303 = dma.done.wait (%p1595_p2), [#allocation7], 2560  }
  0x72   : > { %1305 = vsyncadd (%p1595_p2), [#allocation7], 4294964736 }
  0x73   : > { %1307 = dma.done.wait (%p1595_p2), [#allocation10], 16  }
  0x74   : > { %1309 = vsyncadd (%p1595_p2), [#allocation10], 4294967280  ;;  %p949_p5 = scmp.ne.s32.totalorder %s1316_s15, 0 }
  0x75   : > { %vm252_vm0 = vcmask (!%p949_p5), 261120   ;;  %v1332_v0 = vmov (!%p949_p5), 0.0  }
  0x76   : > { %251 = sbr.rel (%p949_p5) target bundleno = 125 (0x7d), region = 56  ;;  %253 = vst.msk [vmem:[#allocation2] sm:$0xff] (!%p949_p5), %vm252_vm0, %v1332_v0  ;;  %254 = vst.msk [vmem:[#allocation2 + $0x8] sm:$0xff] (!%p949_p5), %vm252_vm0, %v1332_v0 }
  0x7d PF: > { %s950_s20 = sshll.u32 %s1316_s15, 5  ;;  %v255_v1 = vld [vmem:[#allocation3] sm:$0xff]  ;;  %vm268_vm1 = vcmask 261120   ;;  %v256_v8 = vld [vmem:[#allocation3 + $0x8] sm:$0xff]  ;;  %v1333_v9 = vmov 0.0   ;;  %vm1334_vm2 = vmmov 0  }
  0x7e   : > { %1003 = vmatprep.mubr.msk.f32.mxu0 %vm268_vm1, %v255_v1  ;;  %s260_s23 = scalar_lea.vmem [#allocation6], %s950_s20  ;;  %1006 = vmatprep.subr.mxu1 %v1333_v9  ;;  %s1335_s19 = smov 120   ;;  %vm365_vm3 = vcmask 64512  }
  0x7f   : > { %v261_v2 = vld [vmem:[%s260_s23] sm:$0xff]  ;;  %v262_v3 = vld [vmem:[%s260_s23 + $0x8] sm:$0xff]  ;;  %v263_v4 = vld [vmem:[%s260_s23 + $0x10] sm:$0xff]  ;;  %1008 = vmatprep.mubr.msk.f32.mxu1 %vm1334_vm2, %v1333_v9  ;;  %s1336_s7 = smov 112   ;;  %s951_s14 = sshll.u32 %s1316_s15, 3 }
  0x80   : > { %v1031_v5 = vpack.c.bf16 %v262_v3, %v261_v2  ;;  %v264_v6 = vld [vmem:[%s260_s23 + $0x18] sm:$0xff]  ;;  %s266_s5 = scalar_lea.vmem [#allocation8], %s951_s14  ;;  %p970_p8 = scmp.ne.s32.totalorder %s1316_s15, 3 }
  0x81   : > { %v1035_v7 = vpack.c.bf16 %v264_v6, %v263_v4 }
  0x82   : > { %1032 = vmatprep.subr.bf16.mxu0 %v1031_v5 }
  0x83   : > { %1034 = vmatpush3.bf16.msra.mxu0 %v1031_v5 }
  0x84   : > { %1036 = vmatprep.subr.bf16.mxu0 %v1035_v7 }
  0x87   : > { %1038 = vmatpush3.bf16.msra.mxu0 %v1035_v7 }
  0x88   : > { %1016 = vmatprep.subr.mxu0 %v1333_v9 }
  0x8a   : > { %1004 = vmatmul.mubr.msk.f32.vlgmr.msra.gmra.mrb[0].mxu0 %vm268_vm1, %v256_v8 }
  0x8b   : > { %1018 = vmatprep.mubr.msk.f32.mxu0 %vm1334_vm2, %v1333_v9 }
 0x15d   : > { %v1005_v10 = vpop.f32.mrb[0].mxu0 }
 0x15e   : > { %v955_v11 = vclamps-f32 %v1005_v10, 7.999756  ;;  %v341_v12 = vpop.f32.mrb[1].mxu0  ;;  %v267_v10 = vld [vmem:[%s266_s5] sm:$0xff] }
 0x15f   : > { %v954_v13 = vclamps-f32 %v341_v12, 7.999756 }
 0x160   : > { %v355_v14 = vmul.f32 4096.0, %v955_v11 }
 0x161   : > { %v354_v15 = vmul.f32 4096.0, %v954_v13 }
 0x162   : > { %v1041_v16 = vtrunc.f32 %v355_v14 }
 0x163   : > { %v1039_v17 = vtrunc.f32 %v354_v15 }
 0x164   : > { %v1042_v18 = vcvt.f32.s32 %v1041_v16 }
 0x165   : > { %v1040_v19 = vcvt.f32.s32 %v1039_v17 }
 0x166   : > { %v359_v21 = vcvt.s32.f32 %v1042_v18 }
 0x167   : > { %v358_v20 = vcvt.s32.f32 %v1040_v19 }
 0x168   : > { %v361_v23 = vmul.f32 0.00024414063, %v359_v21 }
 0x169   : > { %v360_v22 = vmul.f32 0.00024414063, %v358_v20 }
 0x16b   : > { %363 = vrot.lane.b32.xlu0 %v360_v22, %s1335_s19 }
 0x16f   : > { %441 = vrot.lane.b32.xlu0 %v361_v23, %s1335_s19 }
 0x1dd   : > { %v364_v24 = vpop.permute.xlu0 %363 }
 0x1de   : > { %1007 = vmatpush3.xpose.msk.msra.mxu1 %vm365_vm3, %v364_v24 }
 0x1df   : > { %1011 = vmatprep.subr.mxu1 %v1333_v9 }
 0x1e1   : > { %1009 = vmatmul.mubr.msk.f32.vlgmr.msra.gmra.mrb[0].mxu1 %vm365_vm3, %v360_v22  ;;  %v442_v25 = vpop.permute.xlu0 %441 }
 0x1e2   : > { %1012 = vmatpush3.xpose.msk.msra.mxu1 %vm365_vm3, %v442_v25  ;;  %1013 = vmatprep.mubr.msk.f32.mxu1 %vm1334_vm2, %v1333_v9 }
 0x1e3   : > { %1021 = vmatprep.subr.mxu1 %v1333_v9 }
 0x1e5   : > { %1014 = vmatmul.mubr.msk.f32.vlgmr.msra.gmra.mrb[2].mxu1 %vm365_vm3, %v361_v23 }
 0x1e6   : > { %1023 = vmatprep.mubr.msk.f32.mxu1 %vm1334_vm2, %v1333_v9 }
 0x2b4   : > { %v436_v26 = vpop.f32.mrb[0].mxu1 }
 0x2b5   : > { %v517_v27 = vmul.f32 1448.1547, %v436_v26  ;;  %v1010_v28 = vpop.f32.mrb[1].mxu1 }
 0x2b6   : > { %v257_v28 = vld [vmem:[#allocation2] sm:$0xff] }
 0x2b7   : > { %v960_v29 = vclamps-f32 %v517_v27, 32767.0  ;;  %v258_v27 = vld [vmem:[#allocation2 + $0x8] sm:$0xff] }
 0x2b8   : > { %v513_v30 = vpop.f32.mrb[2].mxu1 }
 0x2b9   : > { %v1043_v31 = vtrunc.f32 %v960_v29  ;;  %v518_v32 = vmul.f32 1448.1547, %v513_v30  ;;  %v1015_v33 = vpop.f32.mrb[3].mxu1 }
 0x2bb   : > { %v1044_v34 = vcvt.f32.s32 %v1043_v31  ;;  %v961_v35 = vclamps-f32 %v518_v32, 32767.0 }
 0x2bd   : > { %v1045_v36 = vtrunc.f32 %v961_v35  ;;  %v525_v37 = vcvt.s32.f32 %v1044_v34  ;;  %v971_v34 = vld [vmem:[#allocation9] ss:$0 sm:$0xff] (!%p970_p8) }
 0x2bf   : > { %v1046_v38 = vcvt.f32.s32 %v1045_v36  ;;  %v527_v39 = vmul.f32 0.00024414063, %v525_v37 }
 0x2c1   : > { %v526_v40 = vcvt.s32.f32 %v1046_v38  ;;  %v529_v41 = vsel %vm365_vm3, %v527_v39, -inf }
 0x2c2   : > { %530 = vmax.xlane.f32.xlu1 %v529_v41 }
 0x2c3   : > { %v528_v42 = vmul.f32 0.00024414063, %v526_v40 }
 0x2c5   : > { %v532_v43 = vsel %vm365_vm3, %v528_v42, -inf }
 0x2c6   : > { %533 = vmax.xlane.f32.xlu1 %v532_v43 }
 0x34f   : > { %v531_v44 = vpop.xlane.xlu1 %530 }
 0x350   : > { %v535_v45 = vsub.f32 %v527_v39, %v531_v44 }
 0x352   : > { %v537_v46 = vmul.f32 1.442695, %v535_v45 }
 0x353   : > { %v534_v47 = vpop.xlane.xlu1 %533 }
 0x354   : > { %1140 = vpow2.f32 %v537_v46  ;;  %v536_v48 = vsub.f32 %v528_v42, %v534_v47 }
 0x356   : > { %v539_v49 = vmul.f32 1.442695, %v536_v48 }
 0x358   : > { %1142 = vpow2.f32 %v539_v49 }
 0x35e   : > { %v1141_v50 = vpop.eup %1140 }
 0x35f   : > { %v541_v51 = vsel %vm365_vm3, %v1141_v50, 0.0 }
 0x360   : > { %542 = vadd.xlane.f32.xlu0 %v541_v51 }
 0x362   : > { %v1143_v52 = vpop.eup %1142 }
 0x363   : > { %v544_v53 = vsel %vm365_vm3, %v1143_v52, 0.0 }
 0x364   : > { %545 = vadd.xlane.f32.xlu1 %v544_v53 }
 0x375   : > { %563 = vrot.lane.b32.xlu1 %v360_v22, %s1336_s7 }
 0x379   : > { %639 = vrot.lane.b32.xlu1 %v361_v23, %s1336_s7 }
 0x3ed   : > { %v543_v54 = vpop.xlane.xlu0 %542 }
 0x3ee   : > { %1144 = vrcp.f32 %v543_v54 }
 0x3f1   : > { %v546_v55 = vpop.xlane.xlu1 %545 }
 0x3f2   : > { %1146 = vrcp.f32 %v546_v55 }
 0x3f5   : > { %v564_v56 = vpop.permute.xlu1 %563 }
 0x3f6   : > { %1017 = vmatpush3.msra.mxu0 %v564_v56 }
 0x3f7   : > { %1026 = vmatprep.subr.mxu0 %v267_v10 }
 0x3f8   : > { %v1145_v57 = vpop.eup %1144 }
 0x3f9   : > { %v548_v58 = vmul.f32 %v1145_v57, %v1141_v50  ;;  %v640_v59 = vpop.permute.xlu1 %639 }
 0x3fa   : > { %1022 = vmatpush3.msra.mxu1 %v640_v59 }
 0x3fb   : > { %v962_v60 = vclamps-f32 %v548_v58, 7.999756 }
 0x3fc   : > { %v1147_v61 = vpop.eup %1146 }
 0x3fd   : > { %v555_v62 = vmul.f32 4096.0, %v962_v60  ;;  %v550_v63 = vmul.f32 %v1147_v61, %v1143_v52 }
 0x3ff   : > { %v1047_v0 = vtrunc.f32 %v555_v62  ;;  %v963_v1 = vclamps-f32 %v550_v63, 7.999756 }
 0x401   : > { %v1048_v2 = vcvt.f32.s32 %v1047_v0  ;;  %v556_v3 = vmul.f32 4096.0, %v963_v1 }
 0x403   : > { %v1049_v4 = vtrunc.f32 %v556_v3  ;;  %v559_v5 = vcvt.s32.f32 %v1048_v2 }
 0x405   : > { %v561_v6 = vmul.f32 0.00024414063, %v559_v5  ;;  %v1050_v7 = vcvt.f32.s32 %v1049_v4 }
 0x407   : > { %1019 = vmatmul.mubr.msk.f32.vlgmr.msra.gmra.mrb[2].mxu0 %vm365_vm3, %v561_v6  ;;  %v560_v8 = vcvt.s32.f32 %v1050_v7 }
 0x408   : > { %1027 = vmatpush3.msra.mxu0 %v267_v10 }
 0x409   : > { %v562_v9 = vmul.f32 0.00024414063, %v560_v8 }
 0x40b   : > { %1024 = vmatmul.mubr.msk.f32.vlgmr.msra.gmra.mrb[4].mxu1 %vm365_vm3, %v562_v9 }
 0x4da   : > { %v635_v11 = vpop.f32.mrb[2].mxu0 }
 0x4db   : > { %v966_v12 = vclamps-f32 %v635_v11, 7.999756  ;;  %v1020_v13 = vpop.f32.mrb[3].mxu0 }
 0x4dd   : > { %v719_v14 = vmul.f32 4096.0, %v966_v12 }
 0x4de   : > { %v711_v15 = vpop.f32.mrb[4].mxu1 }
 0x4df   : > { %v1051_v16 = vtrunc.f32 %v719_v14  ;;  %v967_v17 = vclamps-f32 %v711_v15, 7.999756  ;;  %v1025_v18 = vpop.f32.mrb[5].mxu1 }
 0x4e1   : > { %v1052_v19 = vcvt.f32.s32 %v1051_v16  ;;  %v720_v20 = vmul.f32 4096.0, %v967_v17 }
 0x4e3   : > { %v723_v21 = vcvt.s32.f32 %v1052_v19  ;;  %v1053_v22 = vtrunc.f32 %v720_v20 }
 0x4e5   : > { %v725_v23 = vmul.f32 0.00024414063, %v723_v21  ;;  %v1054_v24 = vcvt.f32.s32 %v1053_v22 }
 0x4e7   : > { %v724_v25 = vcvt.s32.f32 %v1054_v24  ;;  %1028 = vmatprep.mubr.msk.f32.mxu0 %vm365_vm3, %v725_v23 }
 0x4e9   : > { %v726_v26 = vmul.f32 0.00024414063, %v724_v25 }
 0x4eb   : > { %1029 = vmatmul.mubr.msk.f32.vlgmr.msra.gmra.mrb[4].mxu0 %vm365_vm3, %v726_v26 }
 0x5bc   : > { %815 = sbr.rel (%p970_p8) target bundleno = 1497 (0x5d9), region = 60 }
 0x5be   : > { %v1030_v29 = vpop.f32.mrb[4].mxu0 }
 0x5bf   : > { %v809_v30 = vadd.f32 %v1030_v29, %v258_v27  ;;  %v799_v31 = vpop.f32.mrb[5].mxu0 }
 0x5c0   : > { %v808_v32 = vadd.f32 %v799_v31, %v257_v28 }
 0x5c1   : > { %811 = vst.msk [vmem:[#allocation2 + $0x8] sm:$0xff] %vm268_vm1, %v809_v30 }
 0x5c2   : > { %810 = vst.msk [vmem:[#allocation2] sm:$0xff] %vm268_vm1, %v808_v32 }
 0x5c8   : > { %v817_v35 = vld [vmem:[#allocation2 + $0x8] sm:$0xff] }
 0x5c9   : > { %v816_v33 = vld [vmem:[#allocation2] sm:$0xff]  ;;  %v826_v37 = vadd.f32 %v971_v34, %v817_v35 }
 0x5ca   : > { %v825_v36 = vadd.f32 %v971_v34, %v816_v33 }
 0x5cb   : > { %v973_v39 = vclamps-f32 %v826_v37, 7.999756 }
 0x5cc   : > { %v972_v38 = vclamps-f32 %v825_v36, 7.999756 }
 0x5cd   : > { %v832_v41 = vmul.f32 4096.0, %v973_v39 }
 0x5ce   : > { %v831_v40 = vmul.f32 4096.0, %v972_v38 }
 0x5cf   : > { %v1057_v43 = vtrunc.f32 %v832_v41 }
 0x5d0   : > { %v1055_v42 = vtrunc.f32 %v831_v40 }
 0x5d1   : > { %v1058_v45 = vcvt.f32.s32 %v1057_v43 }
 0x5d2   : > { %v1056_v44 = vcvt.f32.s32 %v1055_v42 }
 0x5d3   : > { %v836_v47 = vcvt.s32.f32 %v1058_v45 }
 0x5d4   : > { %v835_v46 = vcvt.s32.f32 %v1056_v44 }
 0x5d5   : > { %v838_v49 = vmul.f32 0.00024414063, %v836_v47 }
 0x5d6   : > { %v837_v48 = vmul.f32 0.00024414063, %v835_v46 }
 0x5d7   : > { %840 = vst.msk [vmem:[#allocation11 + $0x8] sm:$0xff] %vm268_vm1, %v838_v49 }
 0x5d8   : > { %839 = vst.msk [vmem:[#allocation11] sm:$0xff] %vm268_vm1, %v837_v48 }
 0x5d9 PF: > { %p1546_p10 = scmp.eq.s32.totalorder %s938_s18, 3  ;;  %s1337_s6 = smov [#allocation11]  }
 0x5da   : > { %s850_s27 = sshll.u32 %s1337_s6, 4  ;;  %s851_s27 = int_to_ptr.vmem [resolvable:$true] %s850_s27 }
 0x5db   : > { %s1260_s22 = scalar_lea.vmem %s851_s27, 256  ;;  %p1267_p6 = scmp.lt.s32.totalorder %s851_s27, %s851_s27 }
 0x5dc   : > { %p1261_p11 = scmp.ne.s32.totalorder %s851_s27, %s1260_s22  ;;  %p1268_p0 = scmp.lt.s32.totalorder %s1260_s22, %s1260_s22 }
 0x5de   : > { %p1262_p12 = pnand %p1261_p11, %p1546_p10  ;;  %p1269_p1 = por %p1268_p0, %p1267_p6 }
 0x5e0   : > { %p1263_p13 = pneg %p1262_p12 }
 0x5e2   : > { %p1270_p4 = pnand %p1269_p1, %p1263_p13 }
 0x5e4   : > { %1273 = shalt.err (!%p1270_p4)
}
 0x5e5   : > { %s1274_s18 = scalar_lea.hbm %s1585_s4, 256 }
 0x5e6   : > { %p1275_p7 = scmp.ne.s32.totalorder %s1585_s4, %s1274_s18  ;;  %p1280_p2 = scmp.lt.u32.totalorder %s1274_s18, %s1585_s4 }
 0x5e8   : > { %p1276_p9 = pnand %p1275_p7, %p1546_p10 }
 0x5ea   : > { %p1277_p3 = pneg %p1276_p9 }
 0x5ec   : > { %p1282_p5 = pnand %p1280_p2, %p1277_p3 }
 0x5ee   : > { %1285 = shalt.err (!%p1282_p5)
}
 0x5ef   : > { %s1338_s28 = smov 128   ;;  %s1339_s29 = smov 8  }
 0x5f0   : > { %1076 = dma.vmem_to_hbm [thread:$0]  (%p1546_p10), %s851_s27, 256, %s1585_s4, [#allocation5], %s1338_s28, %s1338_s28, %s1339_s29  }
 0x5f1   : > { %1311 = dma.done.wait (%p1546_p10), [#allocation5], 256  }
 0x5f2   : > { %1313 = vsyncadd (%p1546_p10), [#allocation5], 4294967040 }
 0x5f3 PF: > { %s18_s17 = sadd.s32 1, %s1324_s17   ;;  %s1597_s15 = smov %s1320_s16 }
 0x5f4   : > { %p15_p8 = scmp.ge.s32.totalorder %s18_s17, 6   ;;  %s1598_s16 = smov %s1600_s24 }
 0x5f6   :  { %17 = sbr.rel (!%p15_p8) target bundleno = 5 (0x5), region = 89 }
 0x5fd   :  { %866 = vsyncpa [#allocation4], 1 }
 0x5fe   :  { %868 = vsyncpa [#allocation4 + $0x1], 1 }
 0x5ff   :  { %869 = vsyncpa [#allocation7], 1 }
 0x600   :  { %870 = vsyncpa [#allocation10], 1 }
 0x601   :  { %871 = vsyncpa [#allocation5], 1 }
 0x602   :  { %873 = vsyncpa [#allocation5 + $0x1], 1 }

</bundles_post_ra>
